<compile_context>
chip_gen: v7x
topology: tpu7x:2x2x1
jax: 0.10.0
libtpu: 0.0.40
codegen_flags: <defaults>
</compile_context>

<pallas_src>
import functools
import math

import jax
import jax.numpy as jnp
from jax.experimental import pallas as pl
from jax.experimental.pallas import tpu as pltpu


# ---------------------------------------------------------------------------
# In-kernel GELU (exact-erf semantics, matching PyTorch nn.GELU() default).
# ---------------------------------------------------------------------------
_ERF_P = 0.3275911
_ERF_C = (0.254829592, -0.284496736, 1.421413741, -1.453152027, 1.061405429)


def _gelu_erf(x):
    """GELU via the Abramowitz&Stegun 7.1.26 erf polynomial (|err| < 1.5e-7).

    The divide goes to the EUP as an approximate reciprocal plus one Newton
    step (cheap, ~f32 accurate), exp also runs on the EUP; the remaining
    polynomial is a handful of VALU FMAs in f32 (v5e-safe)."""
    z = x * 0.7071067811865476
    az = jnp.abs(z)
    d = 1.0 + _ERF_P * az
    r = pl.reciprocal(d, approx=True)
    t = r * (2.0 - d * r)                       # one Newton refinement
    c1, c2, c3, c4, c5 = _ERF_C
    poly = t * (c1 + t * (c2 + t * (c3 + t * (c4 + t * c5))))
    erf_az = 1.0 - poly * jnp.exp(-az * az)
    erf_z = jnp.where(z >= 0, erf_az, -erf_az)
    return 0.5 * x * (1.0 + erf_z)


# ---------------------------------------------------------------------------
# Fused DoubleConv kernel.  One grid step = B images packed along lanes.
#   x_ref     : (1, C_in, L)   pooled images, L = B*hw
#   masks_ref : (9, L)         per-tap validity masks (rows + cols, per image)
#   seg_ref   : (B, L)         one-hot image membership (for per-image GN)
#   segt_ref  : (L, B)         its transpose
#   w*_ref    : (C_out, 9*C_in) bf16 stacked conv weights, tap-major
#   b*/g*/be* : (C, 1) f32 bias / GN gamma / GN beta
#   pad_ref   : (max(C_in, C_mid), L + 2*(wp+1)) shared row-padded scratch
# ---------------------------------------------------------------------------
def _down_doubleconv_kernel(x_ref, masks_ref, seg_ref, segt_ref,
                            w1_ref, b1_ref, g1_ref, be1_ref,
                            w2_ref, b2_ref, g2_ref, be2_ref,
                            o_ref, pad_ref,
                            *, wp, hw, eps):
    L = x_ref.shape[-1]
    padw = wp + 1
    masks = masks_ref[...]                        # (9, L) f32, loaded once
    seg = seg_ref[...]                            # (B, L) f32
    segt = segt_ref[...]                          # (L, B) f32

    def conv3x3(src, w_ref, b_ref):
        c = src.shape[0]
        # Zero only the two small margins (garbage there must not leak as NaN
        # through the mask multiplies); the interior is fully overwritten.
        z = jnp.zeros((c, padw), jnp.float32)
        pad_ref[:c, 0:padw] = z
        pad_ref[:c, L + padw:L + 2 * padw] = z
        pad_ref[:c, padw:padw + L] = src
        taps = []
        for ky in range(3):
            for kx in range(3):
                t = ky * 3 + kx
                off = ky * wp + kx                         # static lane offset
                win = pad_ref[:c, off:off + L]             # (c, L) f32 window
                if t != 4:                                 # center mask is all-ones
                    win = win * masks[t:t + 1]             # kill OOB / cross-image reads
                taps.append(win)
        # Stack taps along sublanes -> (9c, L); single bf16 MXU matmul, f32 acc.
        stacked = jnp.concatenate(taps, axis=0).astype(jnp.bfloat16)
        out = jnp.dot(w_ref[...], stacked, preferred_element_type=jnp.float32)
        return out + b_ref[...]                            # bias kept in f32

    def groupnorm_gelu(h, g_ref, be_ref):
        # GroupNorm(num_groups=1): stats over all (C, H, W) of EACH image.
        cnt = float(h.shape[0] * hw)
        cs = jnp.sum(h, axis=0, keepdims=True)             # (1, L) channel sums
        css = jnp.sum(h * h, axis=0, keepdims=True)        # (1, L)
        s_img = jnp.dot(cs, segt, preferred_element_type=jnp.float32)    # (1, B)
        ss_img = jnp.dot(css, segt, preferred_element_type=jnp.float32)  # (1, B)
        mean = s_img * (1.0 / cnt)
        var = jnp.maximum(ss_img * (1.0 / cnt) - mean * mean, 0.0)       # clamp >= 0
        inv = jax.lax.rsqrt(var + eps)
        mean_l = jnp.dot(mean, seg, preferred_element_type=jnp.float32)  # (1, L)
        inv_l = jnp.dot(inv, seg, preferred_element_type=jnp.float32)    # (1, L)
        hn = (h - mean_l) * inv_l * g_ref[...] + be_ref[...]
        return _gelu_erf(hn)

    x = x_ref[0]                                           # (C_in, L) f32
    h = conv3x3(x, w1_ref, b1_ref)
    h = groupnorm_gelu(h, g1_ref, be1_ref)
    h = conv3x3(h, w2_ref, b2_ref)
    h = groupnorm_gelu(h, g2_ref, be2_ref)
    o_ref[0] = h.astype(o_ref.dtype)


# ---------------------------------------------------------------------------
# Wrapper: maxpool (fused XLA pass) + fused DoubleConv Pallas kernel.
# ---------------------------------------------------------------------------
def down_forward(x, params, *, eps=1e-5):
    """Forward pass of Down(in_ch, out_ch): MaxPool2d(2) + DoubleConv.

    x: (N, Cin, H, W) float32.
    params: (w1, b1, g1, be1, w2, b2, g2, be2) with PyTorch layouts
            (w: (Cout, Cin, 3, 3), b/g/be: (C,)).
    """
    w1, b1, g1, be1, w2, b2, g2, be2 = params
    N, c_in, H, W = x.shape
    assert H % 2 == 0 and W % 2 == 0
    hp, wp = H // 2, W // 2
    hw = hp * wp
    c_mid = w1.shape[0]
    c_out = w2.shape[0]

    # TODO(synk): fold the 2x2 maxpool into the kernel; kept as one fused XLA
    # reshape+max pass (stride-2 lane decimation in-kernel avoided for now).
    pooled = jnp.max(x.reshape(N, c_in, hp, 2, wp, 2), axis=(3, 5))   # (N,Cin,hp,wp)

    # Pack B images along the lane axis so L = B*hw >= 128 when possible
    # (lane-dense stores + amortized per-grid-step pipeline overhead).
    B = 1 if hw >= 128 else min(N, max(1, 128 // hw))
    while N % B:
        B -= 1
    G = N // B
    L = B * hw
    packed = pooled.reshape(G, B, c_in, hw).transpose(0, 2, 1, 3).reshape(G, c_in, L)

    # Per-tap validity masks (row + column boundaries), identical per image.
    row = jnp.arange(hw, dtype=jnp.int32) // wp
    col = jnp.arange(hw, dtype=jnp.int32) % wp
    mask_list = []
    for ky in range(3):
        for kx in range(3):
            ok = ((row + (ky - 1) >= 0) & (row + (ky - 1) < hp) &
                  (col + (kx - 1) >= 0) & (col + (kx - 1) < wp))
            mask_list.append(ok)
    masks = jnp.tile(jnp.stack(mask_list).astype(jnp.float32), (1, B))   # (9, L)

    # One-hot image-membership matrix for per-image GroupNorm statistics.
    img_id = jnp.arange(L, dtype=jnp.int32) // hw
    seg = (img_id[None, :] ==
           jnp.arange(B, dtype=jnp.int32)[:, None]).astype(jnp.float32)  # (B, L)
    segt = seg.T                                                          # (L, B)

    # Stacked conv weights: (Cout, 9*Cin) tap-major, bf16 MXU operands.
    w1s = jnp.transpose(w1, (0, 2, 3, 1)).reshape(c_mid, 9 * c_in).astype(jnp.bfloat16)
    w2s = jnp.transpose(w2, (0, 2, 3, 1)).reshape(c_out, 9 * c_mid).astype(jnp.bfloat16)
    b1c, g1c, be1c = (v.astype(jnp.float32).reshape(c_mid, 1) for v in (b1, g1, be1))
    b2c, g2c, be2c = (v.astype(jnp.float32).reshape(c_out, 1) for v in (b2, g2, be2))

    padw = wp + 1
    pad_len = L + 2 * padw
    c_max = max(c_in, c_mid)

    # Explicit scoped-VMEM budget derived from the actual block sizes.
    f4, f2 = 4, 2
    est = (2 * c_in * L * f4                        # input blocks (double-buffered)
           + 2 * c_out * L * f4                     # output blocks
           + c_max * pad_len * f4                   # shared pad scratch
           + 2 * (9 + 2 * B) * L * f4               # masks + seg + segT
           + 2 * 9 * (c_mid * c_in + c_out * c_mid) * f2   # stacked bf16 weights
           + 2 * 6 * (c_mid + c_out) * f4           # bias / gamma / beta
           + 9 * (c_in + c_mid) * L * f2            # stacked tap tensors
           + 4 * (c_mid + c_out) * L * f4)          # f32 intermediates (rough)
    vmem_limit = int(min(max(2 * est, 32 << 20), 100 << 20))

    kernel = functools.partial(_down_doubleconv_kernel, wp=wp, hw=hw, eps=eps)
    const2 = lambda g: (0, 0)

    out_packed = pl.pallas_call(
        kernel,
        out_shape=jax.ShapeDtypeStruct((G, c_out, L), x.dtype),
        grid_spec=pltpu.PrefetchScalarGridSpec(
            num_scalar_prefetch=0,
            grid=(G,),
            in_specs=[
                pl.BlockSpec((1, c_in, L), lambda g: (g, 0, 0)),   # packed images
                pl.BlockSpec((9, L), const2),                      # tap masks
                pl.BlockSpec((B, L), const2),                      # seg one-hot
                pl.BlockSpec((L, B), const2),                      # seg^T
                pl.BlockSpec((c_mid, 9 * c_in), const2),           # w1 stacked (bf16)
                pl.BlockSpec((c_mid, 1), const2),                  # b1
                pl.BlockSpec((c_mid, 1), const2),                  # gamma1
                pl.BlockSpec((c_mid, 1), const2),                  # beta1
                pl.BlockSpec((c_out, 9 * c_mid), const2),          # w2 stacked (bf16)
                pl.BlockSpec((c_out, 1), const2),                  # b2
                pl.BlockSpec((c_out, 1), const2),                  # gamma2
                pl.BlockSpec((c_out, 1), const2),                  # beta2
            ],
            out_specs=pl.BlockSpec((1, c_out, L), lambda g: (g, 0, 0)),
            scratch_shapes=[
                pltpu.VMEM((c_max, pad_len), jnp.float32),         # shared pad buffer
            ],
        ),
        compiler_params=pltpu.CompilerParams(
            dimension_semantics=("parallel",),
            vmem_limit_bytes=vmem_limit),
    )(packed, masks, seg, segt,
      w1s, b1c, g1c, be1c,
      w2s, b2c, g2c, be2c)

    out = (out_packed.reshape(G, c_out, B, hp, wp)
           .transpose(0, 2, 1, 3, 4)
           .reshape(N, c_out, hp, wp))
    return out


# ---------------------------------------------------------------------------
# Parameter init mimicking PyTorch defaults, and a plain-JAX reference.
# ---------------------------------------------------------------------------
def init_down_params(key, in_channels, out_channels, dtype=jnp.float32):
    mid = out_channels  # DoubleConv default: mid_channels = out_channels
    ks = jax.random.split(key, 6)

    def conv_init(kw, kb, cin, cout):
        fan_in = cin * 9
        bound = 1.0 / math.sqrt(fan_in)
        w = jax.random.uniform(kw, (cout, cin, 3, 3), dtype, -bound, bound)
        b = jax.random.uniform(kb, (cout,), dtype, -bound, bound)
        return w, b

    w1, b1 = conv_init(ks[0], ks[1], in_channels, mid)
    w2, b2 = conv_init(ks[2], ks[3], mid, out_channels)
    # GroupNorm affine params (PyTorch defaults are ones/zeros); perturb the
    # first pair slightly so the affine path is actually exercised.
    g1 = jnp.ones((mid,), dtype) + 0.1 * jax.random.normal(ks[4], (mid,), dtype)
    be1 = 0.1 * jax.random.normal(ks[5], (mid,), dtype)
    g2 = jnp.ones((out_channels,), dtype)
    be2 = jnp.zeros((out_channels,), dtype)
    return (w1, b1, g1, be1, w2, b2, g2, be2)


def _reference_down(x, params, eps=1e-5):
    """Independent JAX reference with the same semantics as the PyTorch module."""
    w1, b1, g1, be1, w2, b2, g2, be2 = params
    N, c_in, H, W = x.shape
    hp, wp = H // 2, W // 2
    h = jnp.max(x.reshape(N, c_in, hp, 2, wp, 2), axis=(3, 5))

    def conv3x3(h, w, b):
        out = jax.lax.conv_general_dilated(
            h, w, window_strides=(1, 1), padding=((1, 1), (1, 1)),
            dimension_numbers=("NCHW", "OIHW", "NCHW"))
        return out + b.reshape(1, -1, 1, 1)

    def gn_gelu(h, g, be):
        mean = jnp.mean(h, axis=(1, 2, 3), keepdims=True)
        var = jnp.mean((h - mean) ** 2, axis=(1, 2, 3), keepdims=True)
        hn = (h - mean) * jax.lax.rsqrt(var + eps)
        hn = hn * g.reshape(1, -1, 1, 1) + be.reshape(1, -1, 1, 1)
        return 0.5 * hn * (1.0 + jax.lax.erf(hn * 0.7071067811865476))

    h = gn_gelu(conv3x3(h, w1, b1), g1, be1)
    h = gn_gelu(conv3x3(h, w2, b2), g2, be2)
    return h


if __name__ == "__main__":
    key = jax.random.PRNGKey(0)
    k_x, k_p = jax.random.split(key)

    N, Cin, Cout, H, W = 2, 4, 8, 16, 16
    x = jax.random.normal(k_x, (N, Cin, H, W), jnp.float32)
    params = init_down_params(k_p, Cin, Cout)

    out = jax.jit(down_forward)(x, params)
    out = jax.block_until_ready(out)

    ref = _reference_down(x, params)
    assert out.shape == (N, Cout, H // 2, W // 2), out.shape
    # Tolerance covers bf16 MXU operands (the dominant error source), GroupNorm
    # amplification of it, and the 1.5e-7 erf approximation; structural bugs
    # (wrong tap / mask / per-image GN segmentation) give O(1) errors.
    assert jnp.allclose(out, ref, atol=2e-2, rtol=2e-2), \
        float(jnp.max(jnp.abs(out - ref)))

    print("KERNEL_OK")
</pallas_src>

<mosaic_0001>
module attributes {stable_mosaic.version = 11 : i64} {
  func.func @_down_doubleconv_kernel(%arg0: i32, %arg1: memref<1x4x128xf32, #tpu.memory_space<vmem>>, %arg2: memref<9x128xf32, #tpu.memory_space<vmem>>, %arg3: memref<2x128xf32, #tpu.memory_space<vmem>>, %arg4: memref<128x2xf32, #tpu.memory_space<vmem>>, %arg5: memref<8x36xbf16, #tpu.memory_space<vmem>>, %arg6: memref<8x1xf32, #tpu.memory_space<vmem>>, %arg7: memref<8x1xf32, #tpu.memory_space<vmem>>, %arg8: memref<8x1xf32, #tpu.memory_space<vmem>>, %arg9: memref<8x72xbf16, #tpu.memory_space<vmem>>, %arg10: memref<8x1xf32, #tpu.memory_space<vmem>>, %arg11: memref<8x1xf32, #tpu.memory_space<vmem>>, %arg12: memref<8x1xf32, #tpu.memory_space<vmem>>, %arg13: memref<1x8x128xf32, #tpu.memory_space<vmem>>, %arg14: memref<8x146xf32, #tpu.memory_space<vmem>>) attributes {dimension_semantics = [#tpu.dimension_semantics<parallel>], iteration_bounds = array<i64: 1>, scalar_prefetch = 0 : i64, scratch_operands = 1 : i64, tpu.core_type = #tpu.core_type<tc>, window_params = [{transform_indices = @transform_0, window_bounds = array<i64: 1, 4, 128>}, {pipeline_mode = #tpu.pipeline_mode<synchronous>, transform_indices = @transform_1, window_bounds = array<i64: 9, 128>}, {pipeline_mode = #tpu.pipeline_mode<synchronous>, transform_indices = @transform_2, window_bounds = array<i64: 2, 128>}, {pipeline_mode = #tpu.pipeline_mode<synchronous>, transform_indices = @transform_3, window_bounds = array<i64: 128, 2>}, {pipeline_mode = #tpu.pipeline_mode<synchronous>, transform_indices = @transform_4, window_bounds = array<i64: 8, 36>}, {pipeline_mode = #tpu.pipeline_mode<synchronous>, transform_indices = @transform_5, window_bounds = array<i64: 8, 1>}, {pipeline_mode = #tpu.pipeline_mode<synchronous>, transform_indices = @transform_6, window_bounds = array<i64: 8, 1>}, {pipeline_mode = #tpu.pipeline_mode<synchronous>, transform_indices = @transform_7, window_bounds = array<i64: 8, 1>}, {pipeline_mode = #tpu.pipeline_mode<synchronous>, transform_indices = @transform_8, window_bounds = array<i64: 8, 72>}, {pipeline_mode = #tpu.pipeline_mode<synchronous>, transform_indices = @transform_9, window_bounds = array<i64: 8, 1>}, {pipeline_mode = #tpu.pipeline_mode<synchronous>, transform_indices = @transform_10, window_bounds = array<i64: 8, 1>}, {pipeline_mode = #tpu.pipeline_mode<synchronous>, transform_indices = @transform_11, window_bounds = array<i64: 8, 1>}, {transform_indices = @transform_12, window_bounds = array<i64: 1, 8, 128>}]} {
    %c0 = arith.constant 0 : index
    %c0_0 = arith.constant 0 : index
    %0 = vector.load %arg2[%c0, %c0_0] : memref<9x128xf32, #tpu.memory_space<vmem>>, vector<9x128xf32>
    %c0_1 = arith.constant 0 : index
    %c0_2 = arith.constant 0 : index
    %1 = vector.load %arg3[%c0_1, %c0_2] : memref<2x128xf32, #tpu.memory_space<vmem>>, vector<2x128xf32>
    %c0_3 = arith.constant 0 : index
    %c0_4 = arith.constant 0 : index
    %2 = vector.load %arg4[%c0_3, %c0_4] : memref<128x2xf32, #tpu.memory_space<vmem>>, vector<128x2xf32>
    %c0_5 = arith.constant 0 : index
    %c0_6 = arith.constant 0 : index
    %c0_7 = arith.constant 0 : index
    %3 = vector.load %arg1[%c0_5, %c0_6, %c0_7] : memref<1x4x128xf32, #tpu.memory_space<vmem>>, vector<1x4x128xf32>
    %4 = vector.shape_cast %3 : vector<1x4x128xf32> to vector<4x128xf32>
    %cst = arith.constant 0.000000e+00 : f32
    %5 = vector.broadcast %cst : f32 to vector<4x9xf32>
    %c0_8 = arith.constant 0 : index
    %c0_9 = arith.constant 0 : index
    %6 = vector.load %arg14[%c0_8, %c0_9] : memref<8x146xf32, #tpu.memory_space<vmem>>, vector<4x9xf32>
    tpu.vector_store %arg14[%c0_8, %c0_9], %5 {strides = array<i32>} : memref<8x146xf32, #tpu.memory_space<vmem>>, vector<4x9xf32>,
    %c0_10 = arith.constant 0 : index
    %c137 = arith.constant 137 : index
    %7 = vector.load %arg14[%c0_10, %c137] : memref<8x146xf32, #tpu.memory_space<vmem>>, vector<4x9xf32>
    tpu.vector_store %arg14[%c0_10, %c137], %5 {strides = array<i32>} : memref<8x146xf32, #tpu.memory_space<vmem>>, vector<4x9xf32>,
    %c0_11 = arith.constant 0 : index
    %c9 = arith.constant 9 : index
    %8 = vector.load %arg14[%c0_11, %c9] : memref<8x146xf32, #tpu.memory_space<vmem>>, vector<4x128xf32>
    tpu.vector_store %arg14[%c0_11, %c9], %4 {strides = array<i32>} : memref<8x146xf32, #tpu.memory_space<vmem>>, vector<4x128xf32>,
    %c0_12 = arith.constant 0 : index
    %c0_13 = arith.constant 0 : index
    %9 = vector.load %arg14[%c0_12, %c0_13] : memref<8x146xf32, #tpu.memory_space<vmem>>, vector<4x128xf32>
    %10 = vector.extract_strided_slice %0 {offsets = [0, 0], sizes = [1, 128], strides = [1, 1]} : vector<9x128xf32> to vector<1x128xf32>
    %11 = vector.broadcast %10 : vector<1x128xf32> to vector<4x128xf32>
    %12 = arith.mulf %9, %11 : vector<4x128xf32>
    %c0_14 = arith.constant 0 : index
    %c1 = arith.constant 1 : index
    %13 = vector.load %arg14[%c0_14, %c1] : memref<8x146xf32, #tpu.memory_space<vmem>>, vector<4x128xf32>
    %14 = vector.extract_strided_slice %0 {offsets = [1, 0], sizes = [1, 128], strides = [1, 1]} : vector<9x128xf32> to vector<1x128xf32>
    %15 = vector.broadcast %14 : vector<1x128xf32> to vector<4x128xf32>
    %16 = arith.mulf %13, %15 : vector<4x128xf32>
    %c0_15 = arith.constant 0 : index
    %c2 = arith.constant 2 : index
    %17 = vector.load %arg14[%c0_15, %c2] : memref<8x146xf32, #tpu.memory_space<vmem>>, vector<4x128xf32>
    %18 = vector.extract_strided_slice %0 {offsets = [2, 0], sizes = [1, 128], strides = [1, 1]} : vector<9x128xf32> to vector<1x128xf32>
    %19 = vector.broadcast %18 : vector<1x128xf32> to vector<4x128xf32>
    %20 = arith.mulf %17, %19 : vector<4x128xf32>
    %c0_16 = arith.constant 0 : index
    %c8 = arith.constant 8 : index
    %21 = vector.load %arg14[%c0_16, %c8] : memref<8x146xf32, #tpu.memory_space<vmem>>, vector<4x128xf32>
    %22 = vector.extract_strided_slice %0 {offsets = [3, 0], sizes = [1, 128], strides = [1, 1]} : vector<9x128xf32> to vector<1x128xf32>
    %23 = vector.broadcast %22 : vector<1x128xf32> to vector<4x128xf32>
    %24 = arith.mulf %21, %23 : vector<4x128xf32>
    %c0_17 = arith.constant 0 : index
    %c9_18 = arith.constant 9 : index
    %25 = vector.load %arg14[%c0_17, %c9_18] : memref<8x146xf32, #tpu.memory_space<vmem>>, vector<4x128xf32>
    %c0_19 = arith.constant 0 : index
    %c10 = arith.constant 10 : index
    %26 = vector.load %arg14[%c0_19, %c10] : memref<8x146xf32, #tpu.memory_space<vmem>>, vector<4x128xf32>
    %27 = vector.extract_strided_slice %0 {offsets = [5, 0], sizes = [1, 128], strides = [1, 1]} : vector<9x128xf32> to vector<1x128xf32>
    %28 = vector.broadcast %27 : vector<1x128xf32> to vector<4x128xf32>
    %29 = arith.mulf %26, %28 : vector<4x128xf32>
    %c0_20 = arith.constant 0 : index
    %c16 = arith.constant 16 : index
    %30 = vector.load %arg14[%c0_20, %c16] : memref<8x146xf32, #tpu.memory_space<vmem>>, vector<4x128xf32>
    %31 = vector.extract_strided_slice %0 {offsets = [6, 0], sizes = [1, 128], strides = [1, 1]} : vector<9x128xf32> to vector<1x128xf32>
    %32 = vector.broadcast %31 : vector<1x128xf32> to vector<4x128xf32>
    %33 = arith.mulf %30, %32 : vector<4x128xf32>
    %c0_21 = arith.constant 0 : index
    %c17 = arith.constant 17 : index
    %34 = vector.load %arg14[%c0_21, %c17] : memref<8x146xf32, #tpu.memory_space<vmem>>, vector<4x128xf32>
    %35 = vector.extract_strided_slice %0 {offsets = [7, 0], sizes = [1, 128], strides = [1, 1]} : vector<9x128xf32> to vector<1x128xf32>
    %36 = vector.broadcast %35 : vector<1x128xf32> to vector<4x128xf32>
    %37 = arith.mulf %34, %36 : vector<4x128xf32>
    %c0_22 = arith.constant 0 : index
    %c18 = arith.constant 18 : index
    %38 = vector.load %arg14[%c0_22, %c18] : memref<8x146xf32, #tpu.memory_space<vmem>>, vector<4x128xf32>
    %39 = vector.extract_strided_slice %0 {offsets = [8, 0], sizes = [1, 128], strides = [1, 1]} : vector<9x128xf32> to vector<1x128xf32>
    %40 = vector.broadcast %39 : vector<1x128xf32> to vector<4x128xf32>
    %41 = arith.mulf %38, %40 : vector<4x128xf32>
    %42 = tpu.concatenate %12, %16, %20, %24, %25, %29, %33, %37, %41 in 0 : vector<4x128xf32>, vector<4x128xf32>, vector<4x128xf32>, vector<4x128xf32>, vector<4x128xf32>, vector<4x128xf32>, vector<4x128xf32>, vector<4x128xf32>, vector<4x128xf32> -> vector<36x128xf32>
    %43 = arith.truncf %42 : vector<36x128xf32> to vector<36x128xbf16>
    %c0_23 = arith.constant 0 : index
    %c0_24 = arith.constant 0 : index
    %44 = vector.load %arg5[%c0_23, %c0_24] : memref<8x36xbf16, #tpu.memory_space<vmem>>, vector<8x36xbf16>
    %cst_25 = arith.constant dense<0.000000e+00> : vector<8x128xf32>
    %45 = tpu.matmul %44, %43, %cst_25 {dimension_numbers = #tpu.dot_dimension_numbers<[1], [0], [0], [1], [0, 0, 1, 1], [], []>} : vector<8x36xbf16>, vector<36x128xbf16>, vector<8x128xf32> -> vector<8x128xf32>
    %c0_26 = arith.constant 0 : index
    %c0_27 = arith.constant 0 : index
    %46 = vector.load %arg6[%c0_26, %c0_27] : memref<8x1xf32, #tpu.memory_space<vmem>>, vector<8x1xf32>
    %47 = vector.broadcast %46 : vector<8x1xf32> to vector<8x128xf32>
    %48 = arith.addf %45, %47 : vector<8x128xf32>
    %cst_28 = arith.constant dense<0.000000e+00> : vector<128xf32>
    %49 = vector.multi_reduction <add>, %48, %cst_28 [0] : vector<8x128xf32> to vector<128xf32>
    %50 = vector.shape_cast %49 : vector<128xf32> to vector<1x128xf32>
    %51 = arith.mulf %48, %48 : vector<8x128xf32>
    %cst_29 = arith.constant dense<0.000000e+00> : vector<128xf32>
    %52 = vector.multi_reduction <add>, %51, %cst_29 [0] : vector<8x128xf32> to vector<128xf32>
    %53 = vector.shape_cast %52 : vector<128xf32> to vector<1x128xf32>
    %cst_30 = arith.constant dense<0.000000e+00> : vector<1x2xf32>
    %54 = tpu.matmul %50, %2, %cst_30 {dimension_numbers = #tpu.dot_dimension_numbers<[1], [0], [0], [1], [0, 0, 1, 1], [], []>} : vector<1x128xf32>, vector<128x2xf32>, vector<1x2xf32> -> vector<1x2xf32>
    %cst_31 = arith.constant dense<0.000000e+00> : vector<1x2xf32>
    %55 = tpu.matmul %53, %2, %cst_31 {dimension_numbers = #tpu.dot_dimension_numbers<[1], [0], [0], [1], [0, 0, 1, 1], [], []>} : vector<1x128xf32>, vector<128x2xf32>, vector<1x2xf32> -> vector<1x2xf32>
    %cst_32 = arith.constant 0.001953125 : f32
    %56 = vector.broadcast %cst_32 : f32 to vector<1x2xf32>
    %57 = arith.mulf %54, %56 : vector<1x2xf32>
    %cst_33 = arith.constant 0.001953125 : f32
    %58 = vector.broadcast %cst_33 : f32 to vector<1x2xf32>
    %59 = arith.mulf %55, %58 : vector<1x2xf32>
    %60 = arith.mulf %57, %57 : vector<1x2xf32>
    %61 = arith.subf %59, %60 : vector<1x2xf32>
    %cst_34 = arith.constant 0.000000e+00 : f32
    %62 = vector.broadcast %cst_34 : f32 to vector<1x2xf32>
    %63 = arith.maximumf %61, %62 : vector<1x2xf32>
    %cst_35 = arith.constant 9.99999974E-6 : f32
    %64 = vector.broadcast %cst_35 : f32 to vector<1x2xf32>
    %65 = arith.addf %63, %64 : vector<1x2xf32>
    %66 = math.rsqrt %65 : vector<1x2xf32>
    %cst_36 = arith.constant dense<0.000000e+00> : vector<1x128xf32>
    %67 = tpu.matmul %57, %1, %cst_36 {dimension_numbers = #tpu.dot_dimension_numbers<[1], [0], [0], [1], [0, 0, 1, 1], [], []>} : vector<1x2xf32>, vector<2x128xf32>, vector<1x128xf32> -> vector<1x128xf32>
    %cst_37 = arith.constant dense<0.000000e+00> : vector<1x128xf32>
    %68 = tpu.matmul %66, %1, %cst_37 {dimension_numbers = #tpu.dot_dimension_numbers<[1], [0], [0], [1], [0, 0, 1, 1], [], []>} : vector<1x2xf32>, vector<2x128xf32>, vector<1x128xf32> -> vector<1x128xf32>
    %69 = vector.broadcast %67 : vector<1x128xf32> to vector<8x128xf32>
    %70 = arith.subf %48, %69 : vector<8x128xf32>
    %71 = vector.broadcast %68 : vector<1x128xf32> to vector<8x128xf32>
    %72 = arith.mulf %70, %71 : vector<8x128xf32>
    %c0_38 = arith.constant 0 : index
    %c0_39 = arith.constant 0 : index
    %73 = vector.load %arg7[%c0_38, %c0_39] : memref<8x1xf32, #tpu.memory_space<vmem>>, vector<8x1xf32>
    %74 = vector.broadcast %73 : vector<8x1xf32> to vector<8x128xf32>
    %75 = arith.mulf %72, %74 : vector<8x128xf32>
    %c0_40 = arith.constant 0 : index
    %c0_41 = arith.constant 0 : index
    %76 = vector.load %arg8[%c0_40, %c0_41] : memref<8x1xf32, #tpu.memory_space<vmem>>, vector<8x1xf32>
    %77 = vector.broadcast %76 : vector<8x1xf32> to vector<8x128xf32>
    %78 = arith.addf %75, %77 : vector<8x128xf32>
    %cst_42 = arith.constant 0.707106769 : f32
    %79 = vector.broadcast %cst_42 : f32 to vector<8x128xf32>
    %80 = arith.mulf %78, %79 : vector<8x128xf32>
    %81 = math.absf %80 : vector<8x128xf32>
    %cst_43 = arith.constant 0.327591091 : f32
    %82 = vector.broadcast %cst_43 : f32 to vector<8x128xf32>
    %83 = arith.mulf %82, %81 : vector<8x128xf32>
    %cst_44 = arith.constant 1.000000e+00 : f32
    %84 = vector.broadcast %cst_44 : f32 to vector<8x128xf32>
    %85 = arith.addf %84, %83 : vector<8x128xf32>
    %86 = tpu.reciprocal %85 {approx = true} : vector<8x128xf32> -> vector<8x128xf32>
    %87 = arith.mulf %85, %86 : vector<8x128xf32>
    %cst_45 = arith.constant 2.000000e+00 : f32
    %88 = vector.broadcast %cst_45 : f32 to vector<8x128xf32>
    %89 = arith.subf %88, %87 : vector<8x128xf32>
    %90 = arith.mulf %86, %89 : vector<8x128xf32>
    %cst_46 = arith.constant 1.06140542 : f32
    %91 = vector.broadcast %cst_46 : f32 to vector<8x128xf32>
    %92 = arith.mulf %90, %91 : vector<8x128xf32>
    %cst_47 = arith.constant -1.45315206 : f32
    %93 = vector.broadcast %cst_47 : f32 to vector<8x128xf32>
    %94 = arith.addf %93, %92 : vector<8x128xf32>
    %95 = arith.mulf %90, %94 : vector<8x128xf32>
    %cst_48 = arith.constant 1.42141378 : f32
    %96 = vector.broadcast %cst_48 : f32 to vector<8x128xf32>
    %97 = arith.addf %96, %95 : vector<8x128xf32>
    %98 = arith.mulf %90, %97 : vector<8x128xf32>
    %cst_49 = arith.constant -0.284496725 : f32
    %99 = vector.broadcast %cst_49 : f32 to vector<8x128xf32>
    %100 = arith.addf %99, %98 : vector<8x128xf32>
    %101 = arith.mulf %90, %100 : vector<8x128xf32>
    %cst_50 = arith.constant 0.254829586 : f32
    %102 = vector.broadcast %cst_50 : f32 to vector<8x128xf32>
    %103 = arith.addf %102, %101 : vector<8x128xf32>
    %104 = arith.mulf %90, %103 : vector<8x128xf32>
    %cst_51 = arith.constant 0.000000e+00 : f32
    %105 = vector.broadcast %cst_51 : f32 to vector<8x128xf32>
    %106 = arith.subf %105, %81 : vector<8x128xf32>
    %107 = arith.mulf %106, %81 : vector<8x128xf32>
    %108 = math.exp %107 : vector<8x128xf32>
    %109 = arith.mulf %104, %108 : vector<8x128xf32>
    %cst_52 = arith.constant 1.000000e+00 : f32
    %110 = vector.broadcast %cst_52 : f32 to vector<8x128xf32>
    %111 = arith.subf %110, %109 : vector<8x128xf32>
    %cst_53 = arith.constant 0.000000e+00 : f32
    %112 = vector.broadcast %cst_53 : f32 to vector<8x128xf32>
    %113 = arith.cmpf oge, %80, %112 : vector<8x128xf32>
    %cst_54 = arith.constant 0.000000e+00 : f32
    %114 = vector.broadcast %cst_54 : f32 to vector<8x128xf32>
    %115 = arith.subf %114, %111 : vector<8x128xf32>
    %116 = arith.select %113, %111, %115 : vector<8x128xi1>, vector<8x128xf32>
    %cst_55 = arith.constant 5.000000e-01 : f32
    %117 = vector.broadcast %cst_55 : f32 to vector<8x128xf32>
    %118 = arith.mulf %117, %78 : vector<8x128xf32>
    %cst_56 = arith.constant 1.000000e+00 : f32
    %119 = vector.broadcast %cst_56 : f32 to vector<8x128xf32>
    %120 = arith.addf %119, %116 : vector<8x128xf32>
    %121 = arith.mulf %118, %120 : vector<8x128xf32>
    %cst_57 = arith.constant 0.000000e+00 : f32
    %122 = vector.broadcast %cst_57 : f32 to vector<8x9xf32>
    %c0_58 = arith.constant 0 : index
    %c0_59 = arith.constant 0 : index
    %123 = vector.load %arg14[%c0_58, %c0_59] : memref<8x146xf32, #tpu.memory_space<vmem>>, vector<8x9xf32>
    tpu.vector_store %arg14[%c0_58, %c0_59], %122 {strides = array<i32>} : memref<8x146xf32, #tpu.memory_space<vmem>>, vector<8x9xf32>,
    %c0_60 = arith.constant 0 : index
    %c137_61 = arith.constant 137 : index
    %124 = vector.load %arg14[%c0_60, %c137_61] : memref<8x146xf32, #tpu.memory_space<vmem>>, vector<8x9xf32>
    tpu.vector_store %arg14[%c0_60, %c137_61], %122 {strides = array<i32>} : memref<8x146xf32, #tpu.memory_space<vmem>>, vector<8x9xf32>,
    %c0_62 = arith.constant 0 : index
    %c9_63 = arith.constant 9 : index
    %125 = vector.load %arg14[%c0_62, %c9_63] : memref<8x146xf32, #tpu.memory_space<vmem>>, vector<8x128xf32>
    tpu.vector_store %arg14[%c0_62, %c9_63], %121 {strides = array<i32>} : memref<8x146xf32, #tpu.memory_space<vmem>>, vector<8x128xf32>,
    %c0_64 = arith.constant 0 : index
    %c0_65 = arith.constant 0 : index
    %126 = vector.load %arg14[%c0_64, %c0_65] : memref<8x146xf32, #tpu.memory_space<vmem>>, vector<8x128xf32>
    %127 = vector.extract_strided_slice %0 {offsets = [0, 0], sizes = [1, 128], strides = [1, 1]} : vector<9x128xf32> to vector<1x128xf32>
    %128 = vector.broadcast %127 : vector<1x128xf32> to vector<8x128xf32>
    %129 = arith.mulf %126, %128 : vector<8x128xf32>
    %c0_66 = arith.constant 0 : index
    %c1_67 = arith.constant 1 : index
    %130 = vector.load %arg14[%c0_66, %c1_67] : memref<8x146xf32, #tpu.memory_space<vmem>>, vector<8x128xf32>
    %131 = vector.extract_strided_slice %0 {offsets = [1, 0], sizes = [1, 128], strides = [1, 1]} : vector<9x128xf32> to vector<1x128xf32>
    %132 = vector.broadcast %131 : vector<1x128xf32> to vector<8x128xf32>
    %133 = arith.mulf %130, %132 : vector<8x128xf32>
    %c0_68 = arith.constant 0 : index
    %c2_69 = arith.constant 2 : index
    %134 = vector.load %arg14[%c0_68, %c2_69] : memref<8x146xf32, #tpu.memory_space<vmem>>, vector<8x128xf32>
    %135 = vector.extract_strided_slice %0 {offsets = [2, 0], sizes = [1, 128], strides = [1, 1]} : vector<9x128xf32> to vector<1x128xf32>
    %136 = vector.broadcast %135 : vector<1x128xf32> to vector<8x128xf32>
    %137 = arith.mulf %134, %136 : vector<8x128xf32>
    %c0_70 = arith.constant 0 : index
    %c8_71 = arith.constant 8 : index
    %138 = vector.load %arg14[%c0_70, %c8_71] : memref<8x146xf32, #tpu.memory_space<vmem>>, vector<8x128xf32>
    %139 = vector.extract_strided_slice %0 {offsets = [3, 0], sizes = [1, 128], strides = [1, 1]} : vector<9x128xf32> to vector<1x128xf32>
    %140 = vector.broadcast %139 : vector<1x128xf32> to vector<8x128xf32>
    %141 = arith.mulf %138, %140 : vector<8x128xf32>
    %c0_72 = arith.constant 0 : index
    %c9_73 = arith.constant 9 : index
    %142 = vector.load %arg14[%c0_72, %c9_73] : memref<8x146xf32, #tpu.memory_space<vmem>>, vector<8x128xf32>
    %c0_74 = arith.constant 0 : index
    %c10_75 = arith.constant 10 : index
    %143 = vector.load %arg14[%c0_74, %c10_75] : memref<8x146xf32, #tpu.memory_space<vmem>>, vector<8x128xf32>
    %144 = vector.extract_strided_slice %0 {offsets = [5, 0], sizes = [1, 128], strides = [1, 1]} : vector<9x128xf32> to vector<1x128xf32>
    %145 = vector.broadcast %144 : vector<1x128xf32> to vector<8x128xf32>
    %146 = arith.mulf %143, %145 : vector<8x128xf32>
    %c0_76 = arith.constant 0 : index
    %c16_77 = arith.constant 16 : index
    %147 = vector.load %arg14[%c0_76, %c16_77] : memref<8x146xf32, #tpu.memory_space<vmem>>, vector<8x128xf32>
    %148 = vector.extract_strided_slice %0 {offsets = [6, 0], sizes = [1, 128], strides = [1, 1]} : vector<9x128xf32> to vector<1x128xf32>
    %149 = vector.broadcast %148 : vector<1x128xf32> to vector<8x128xf32>
    %150 = arith.mulf %147, %149 : vector<8x128xf32>
    %c0_78 = arith.constant 0 : index
    %c17_79 = arith.constant 17 : index
    %151 = vector.load %arg14[%c0_78, %c17_79] : memref<8x146xf32, #tpu.memory_space<vmem>>, vector<8x128xf32>
    %152 = vector.extract_strided_slice %0 {offsets = [7, 0], sizes = [1, 128], strides = [1, 1]} : vector<9x128xf32> to vector<1x128xf32>
    %153 = vector.broadcast %152 : vector<1x128xf32> to vector<8x128xf32>
    %154 = arith.mulf %151, %153 : vector<8x128xf32>
    %c0_80 = arith.constant 0 : index
    %c18_81 = arith.constant 18 : index
    %155 = vector.load %arg14[%c0_80, %c18_81] : memref<8x146xf32, #tpu.memory_space<vmem>>, vector<8x128xf32>
    %156 = vector.extract_strided_slice %0 {offsets = [8, 0], sizes = [1, 128], strides = [1, 1]} : vector<9x128xf32> to vector<1x128xf32>
    %157 = vector.broadcast %156 : vector<1x128xf32> to vector<8x128xf32>
    %158 = arith.mulf %155, %157 : vector<8x128xf32>
    %159 = tpu.concatenate %129, %133, %137, %141, %142, %146, %150, %154, %158 in 0 : vector<8x128xf32>, vector<8x128xf32>, vector<8x128xf32>, vector<8x128xf32>, vector<8x128xf32>, vector<8x128xf32>, vector<8x128xf32>, vector<8x128xf32>, vector<8x128xf32> -> vector<72x128xf32>
    %160 = arith.truncf %159 : vector<72x128xf32> to vector<72x128xbf16>
    %c0_82 = arith.constant 0 : index
    %c0_83 = arith.constant 0 : index
    %161 = vector.load %arg9[%c0_82, %c0_83] : memref<8x72xbf16, #tpu.memory_space<vmem>>, vector<8x72xbf16>
    %cst_84 = arith.constant dense<0.000000e+00> : vector<8x128xf32>
    %162 = tpu.matmul %161, %160, %cst_84 {dimension_numbers = #tpu.dot_dimension_numbers<[1], [0], [0], [1], [0, 0, 1, 1], [], []>} : vector<8x72xbf16>, vector<72x128xbf16>, vector<8x128xf32> -> vector<8x128xf32>
    %c0_85 = arith.constant 0 : index
    %c0_86 = arith.constant 0 : index
    %163 = vector.load %arg10[%c0_85, %c0_86] : memref<8x1xf32, #tpu.memory_space<vmem>>, vector<8x1xf32>
    %164 = vector.broadcast %163 : vector<8x1xf32> to vector<8x128xf32>
    %165 = arith.addf %162, %164 : vector<8x128xf32>
    %cst_87 = arith.constant dense<0.000000e+00> : vector<128xf32>
    %166 = vector.multi_reduction <add>, %165, %cst_87 [0] : vector<8x128xf32> to vector<128xf32>
    %167 = vector.shape_cast %166 : vector<128xf32> to vector<1x128xf32>
    %168 = arith.mulf %165, %165 : vector<8x128xf32>
    %cst_88 = arith.constant dense<0.000000e+00> : vector<128xf32>
    %169 = vector.multi_reduction <add>, %168, %cst_88 [0] : vector<8x128xf32> to vector<128xf32>
    %170 = vector.shape_cast %169 : vector<128xf32> to vector<1x128xf32>
    %cst_89 = arith.constant dense<0.000000e+00> : vector<1x2xf32>
    %171 = tpu.matmul %167, %2, %cst_89 {dimension_numbers = #tpu.dot_dimension_numbers<[1], [0], [0], [1], [0, 0, 1, 1], [], []>} : vector<1x128xf32>, vector<128x2xf32>, vector<1x2xf32> -> vector<1x2xf32>
    %cst_90 = arith.constant dense<0.000000e+00> : vector<1x2xf32>
    %172 = tpu.matmul %170, %2, %cst_90 {dimension_numbers = #tpu.dot_dimension_numbers<[1], [0], [0], [1], [0, 0, 1, 1], [], []>} : vector<1x128xf32>, vector<128x2xf32>, vector<1x2xf32> -> vector<1x2xf32>
    %cst_91 = arith.constant 0.001953125 : f32
    %173 = vector.broadcast %cst_91 : f32 to vector<1x2xf32>
    %174 = arith.mulf %171, %173 : vector<1x2xf32>
    %cst_92 = arith.constant 0.001953125 : f32
    %175 = vector.broadcast %cst_92 : f32 to vector<1x2xf32>
    %176 = arith.mulf %172, %175 : vector<1x2xf32>
    %177 = arith.mulf %174, %174 : vector<1x2xf32>
    %178 = arith.subf %176, %177 : vector<1x2xf32>
    %cst_93 = arith.constant 0.000000e+00 : f32
    %179 = vector.broadcast %cst_93 : f32 to vector<1x2xf32>
    %180 = arith.maximumf %178, %179 : vector<1x2xf32>
    %cst_94 = arith.constant 9.99999974E-6 : f32
    %181 = vector.broadcast %cst_94 : f32 to vector<1x2xf32>
    %182 = arith.addf %180, %181 : vector<1x2xf32>
    %183 = math.rsqrt %182 : vector<1x2xf32>
    %cst_95 = arith.constant dense<0.000000e+00> : vector<1x128xf32>
    %184 = tpu.matmul %174, %1, %cst_95 {dimension_numbers = #tpu.dot_dimension_numbers<[1], [0], [0], [1], [0, 0, 1, 1], [], []>} : vector<1x2xf32>, vector<2x128xf32>, vector<1x128xf32> -> vector<1x128xf32>
    %cst_96 = arith.constant dense<0.000000e+00> : vector<1x128xf32>
    %185 = tpu.matmul %183, %1, %cst_96 {dimension_numbers = #tpu.dot_dimension_numbers<[1], [0], [0], [1], [0, 0, 1, 1], [], []>} : vector<1x2xf32>, vector<2x128xf32>, vector<1x128xf32> -> vector<1x128xf32>
    %186 = vector.broadcast %184 : vector<1x128xf32> to vector<8x128xf32>
    %187 = arith.subf %165, %186 : vector<8x128xf32>
    %188 = vector.broadcast %185 : vector<1x128xf32> to vector<8x128xf32>
    %189 = arith.mulf %187, %188 : vector<8x128xf32>
    %c0_97 = arith.constant 0 : index
    %c0_98 = arith.constant 0 : index
    %190 = vector.load %arg11[%c0_97, %c0_98] : memref<8x1xf32, #tpu.memory_space<vmem>>, vector<8x1xf32>
    %191 = vector.broadcast %190 : vector<8x1xf32> to vector<8x128xf32>
    %192 = arith.mulf %189, %191 : vector<8x128xf32>
    %c0_99 = arith.constant 0 : index
    %c0_100 = arith.constant 0 : index
    %193 = vector.load %arg12[%c0_99, %c0_100] : memref<8x1xf32, #tpu.memory_space<vmem>>, vector<8x1xf32>
    %194 = vector.broadcast %193 : vector<8x1xf32> to vector<8x128xf32>
    %195 = arith.addf %192, %194 : vector<8x128xf32>
    %cst_101 = arith.constant 0.707106769 : f32
    %196 = vector.broadcast %cst_101 : f32 to vector<8x128xf32>
    %197 = arith.mulf %195, %196 : vector<8x128xf32>
    %198 = math.absf %197 : vector<8x128xf32>
    %cst_102 = arith.constant 0.327591091 : f32
    %199 = vector.broadcast %cst_102 : f32 to vector<8x128xf32>
    %200 = arith.mulf %199, %198 : vector<8x128xf32>
    %cst_103 = arith.constant 1.000000e+00 : f32
    %201 = vector.broadcast %cst_103 : f32 to vector<8x128xf32>
    %202 = arith.addf %201, %200 : vector<8x128xf32>
    %203 = tpu.reciprocal %202 {approx = true} : vector<8x128xf32> -> vector<8x128xf32>
    %204 = arith.mulf %202, %203 : vector<8x128xf32>
    %cst_104 = arith.constant 2.000000e+00 : f32
    %205 = vector.broadcast %cst_104 : f32 to vector<8x128xf32>
    %206 = arith.subf %205, %204 : vector<8x128xf32>
    %207 = arith.mulf %203, %206 : vector<8x128xf32>
    %cst_105 = arith.constant 1.06140542 : f32
    %208 = vector.broadcast %cst_105 : f32 to vector<8x128xf32>
    %209 = arith.mulf %207, %208 : vector<8x128xf32>
    %cst_106 = arith.constant -1.45315206 : f32
    %210 = vector.broadcast %cst_106 : f32 to vector<8x128xf32>
    %211 = arith.addf %210, %209 : vector<8x128xf32>
    %212 = arith.mulf %207, %211 : vector<8x128xf32>
    %cst_107 = arith.constant 1.42141378 : f32
    %213 = vector.broadcast %cst_107 : f32 to vector<8x128xf32>
    %214 = arith.addf %213, %212 : vector<8x128xf32>
    %215 = arith.mulf %207, %214 : vector<8x128xf32>
    %cst_108 = arith.constant -0.284496725 : f32
    %216 = vector.broadcast %cst_108 : f32 to vector<8x128xf32>
    %217 = arith.addf %216, %215 : vector<8x128xf32>
    %218 = arith.mulf %207, %217 : vector<8x128xf32>
    %cst_109 = arith.constant 0.254829586 : f32
    %219 = vector.broadcast %cst_109 : f32 to vector<8x128xf32>
    %220 = arith.addf %219, %218 : vector<8x128xf32>
    %221 = arith.mulf %207, %220 : vector<8x128xf32>
    %cst_110 = arith.constant 0.000000e+00 : f32
    %222 = vector.broadcast %cst_110 : f32 to vector<8x128xf32>
    %223 = arith.subf %222, %198 : vector<8x128xf32>
    %224 = arith.mulf %223, %198 : vector<8x128xf32>
    %225 = math.exp %224 : vector<8x128xf32>
    %226 = arith.mulf %221, %225 : vector<8x128xf32>
    %cst_111 = arith.constant 1.000000e+00 : f32
    %227 = vector.broadcast %cst_111 : f32 to vector<8x128xf32>
    %228 = arith.subf %227, %226 : vector<8x128xf32>
    %cst_112 = arith.constant 0.000000e+00 : f32
    %229 = vector.broadcast %cst_112 : f32 to vector<8x128xf32>
    %230 = arith.cmpf oge, %197, %229 : vector<8x128xf32>
    %cst_113 = arith.constant 0.000000e+00 : f32
    %231 = vector.broadcast %cst_113 : f32 to vector<8x128xf32>
    %232 = arith.subf %231, %228 : vector<8x128xf32>
    %233 = arith.select %230, %228, %232 : vector<8x128xi1>, vector<8x128xf32>
    %cst_114 = arith.constant 5.000000e-01 : f32
    %234 = vector.broadcast %cst_114 : f32 to vector<8x128xf32>
    %235 = arith.mulf %234, %195 : vector<8x128xf32>
    %cst_115 = arith.constant 1.000000e+00 : f32
    %236 = vector.broadcast %cst_115 : f32 to vector<8x128xf32>
    %237 = arith.addf %236, %233 : vector<8x128xf32>
    %238 = arith.mulf %235, %237 : vector<8x128xf32>
    %c0_116 = arith.constant 0 : index
    %c0_117 = arith.constant 0 : index
    %c0_118 = arith.constant 0 : index
    %239 = vector.load %arg13[%c0_116, %c0_117, %c0_118] : memref<1x8x128xf32, #tpu.memory_space<vmem>>, vector<1x8x128xf32>
    %240 = vector.shape_cast %239 : vector<1x8x128xf32> to vector<8x128xf32>
    %241 = vector.shape_cast %238 : vector<8x128xf32> to vector<1x8x128xf32>
    tpu.vector_store %arg13[%c0_116, %c0_117, %c0_118], %241 {strides = array<i32>} : memref<1x8x128xf32, #tpu.memory_space<vmem>>, vector<1x8x128xf32>,
    return
  }
  func.func @transform_0(%arg0: i32) -> (i32, i32, i32) {
    %c0_i32 = arith.constant 0 : i32
    %c0_i32_0 = arith.constant 0 : i32
    %c0_i32_1 = arith.constant 0 : i32
    return %arg0, %c0_i32, %c0_i32_0 : i32, i32, i32
  }
  func.func @transform_1(%arg0: i32) -> (i32, i32) {
    %c0_i32 = arith.constant 0 : i32
    %c0_i32_0 = arith.constant 0 : i32
    %c0_i32_1 = arith.constant 0 : i32
    return %c0_i32, %c0_i32_0 : i32, i32
  }
  func.func @transform_2(%arg0: i32) -> (i32, i32) {
    %c0_i32 = arith.constant 0 : i32
    %c0_i32_0 = arith.constant 0 : i32
    %c0_i32_1 = arith.constant 0 : i32
    return %c0_i32, %c0_i32_0 : i32, i32
  }
  func.func @transform_3(%arg0: i32) -> (i32, i32) {
    %c0_i32 = arith.constant 0 : i32
    %c0_i32_0 = arith.constant 0 : i32
    %c0_i32_1 = arith.constant 0 : i32
    return %c0_i32, %c0_i32_0 : i32, i32
  }
  func.func @transform_4(%arg0: i32) -> (i32, i32) {
    %c0_i32 = arith.constant 0 : i32
    %c0_i32_0 = arith.constant 0 : i32
    %c0_i32_1 = arith.constant 0 : i32
    return %c0_i32, %c0_i32_0 : i32, i32
  }
  func.func @transform_5(%arg0: i32) -> (i32, i32) {
    %c0_i32 = arith.constant 0 : i32
    %c0_i32_0 = arith.constant 0 : i32
    %c0_i32_1 = arith.constant 0 : i32
    return %c0_i32, %c0_i32_0 : i32, i32
  }
  func.func @transform_6(%arg0: i32) -> (i32, i32) {
    %c0_i32 = arith.constant 0 : i32
    %c0_i32_0 = arith.constant 0 : i32
    %c0_i32_1 = arith.constant 0 : i32
    return %c0_i32, %c0_i32_0 : i32, i32
  }
  func.func @transform_7(%arg0: i32) -> (i32, i32) {
    %c0_i32 = arith.constant 0 : i32
    %c0_i32_0 = arith.constant 0 : i32
    %c0_i32_1 = arith.constant 0 : i32
    return %c0_i32, %c0_i32_0 : i32, i32
  }
  func.func @transform_8(%arg0: i32) -> (i32, i32) {
    %c0_i32 = arith.constant 0 : i32
    %c0_i32_0 = arith.constant 0 : i32
    %c0_i32_1 = arith.constant 0 : i32
    return %c0_i32, %c0_i32_0 : i32, i32
  }
  func.func @transform_9(%arg0: i32) -> (i32, i32) {
    %c0_i32 = arith.constant 0 : i32
    %c0_i32_0 = arith.constant 0 : i32
    %c0_i32_1 = arith.constant 0 : i32
    return %c0_i32, %c0_i32_0 : i32, i32
  }
  func.func @transform_10(%arg0: i32) -> (i32, i32) {
    %c0_i32 = arith.constant 0 : i32
    %c0_i32_0 = arith.constant 0 : i32
    %c0_i32_1 = arith.constant 0 : i32
    return %c0_i32, %c0_i32_0 : i32, i32
  }
  func.func @transform_11(%arg0: i32) -> (i32, i32) {
    %c0_i32 = arith.constant 0 : i32
    %c0_i32_0 = arith.constant 0 : i32
    %c0_i32_1 = arith.constant 0 : i32
    return %c0_i32, %c0_i32_0 : i32, i32
  }
  func.func @transform_12(%arg0: i32) -> (i32, i32, i32) {
    %c0_i32 = arith.constant 0 : i32
    %c0_i32_0 = arith.constant 0 : i32
    %c0_i32_1 = arith.constant 0 : i32
    return %arg0, %c0_i32, %c0_i32_0 : i32, i32, i32
  }
}

</mosaic_0001>

<bundles_post_ra>
// kernel: tile.9
= control target key start
LH: loop header
LB: loop body
LE: loop exit
PB: predicated region body
PF: predicated region fallthrough
CT: control target
= control target key end

     0   :  { %vm47_vm0 = vcmask 1047556   ;;  %vm49_vm1 = vcmask 523264   ;;  %vm64_vm2 = vcmask 1048064   ;;  %s141_s0 = inlined_call_operand.vmem [shape: f32[9,2,64], index: 0, kind: input, shape index: {}]   ;;  %s142_s1 = inlined_call_operand.vmem [shape: f32[9,128], index: 1, kind: output, shape index: {}]  }
   0x1   :  { %v81_v0 = vld [vmem:[%s141_s0 + $0xe] sm:$0x3]  ;;  %v82_v1 = vld [vmem:[%s141_s0 + $0xc] sm:$0x3]  ;;  %v83_v2 = vld [vmem:[%s141_s0 + $0xa] sm:$0x3] }
   0x2   :  { %13 = vst [vmem:[#allocation0 + $0x38] sm:$0x3] %v81_v0  ;;  %18 = vst [vmem:[#allocation0 + $0x30] sm:$0x3] %v82_v1  ;;  %v84_v3 = vld [vmem:[%s141_s0 + $0x8] sm:$0x3] }
   0x3   :  { %23 = vst [vmem:[#allocation0 + $0x28] sm:$0x3] %v83_v2  ;;  %v85_v4 = vld [vmem:[%s141_s0 + $0x6] sm:$0x3]  ;;  %v86_v5 = vld [vmem:[%s141_s0 + $0x4] sm:$0x3] }
   0x4   :  { %28 = vst [vmem:[#allocation0 + $0x20] sm:$0x3] %v84_v3  ;;  %33 = vst [vmem:[#allocation0 + $0x18] sm:$0x3] %v85_v4  ;;  %v87_v6 = vld [vmem:[%s141_s0 + $0x2] sm:$0x3] }
   0x5   :  { %38 = vst [vmem:[#allocation0 + $0x10] sm:$0x3] %v86_v5  ;;  %v43_v7 = vld [vmem:[%s141_s0] sm:$0x3]  ;;  %42 = vst [vmem:[#allocation0 + $0x8] sm:$0x3] %v87_v6 }
   0x6   :  { %44 = vst [vmem:[#allocation0] sm:$0x3] %v43_v7  ;;  %v80_v8 = vld [vmem:[%s141_s0 + $0x10] sm:$0x3]  ;;  %s91_s0 = smov 64  }
   0x7   :  { %8 = vst [vmem:[#allocation0 + $0x40] sm:$0x3] %v80_v8 }
   0xb   :  { %v59_v9 = vld [vmem:[#allocation0 + $0x1] ss:$8 sm:$0xf0]   ;;  %v46_v10 = vld [vmem:[#allocation0] ss:$8 sm:$0xf0]  }
   0xd   :  { %v45_v11 = vld [vmem:[#allocation0] ss:$8 sm:$0xf]   ;;  %v57_v12 = vld [vmem:[#allocation0 + $0x1] ss:$8 sm:$0xf]  }
   0xe   :  { %v61_v13 = vsel %vm47_vm0, %v59_v9, %v57_v12  ;;  %v48_v14 = vsel %vm47_vm0, %v46_v10, %v45_v11  ;;  %v52_v15 = vld [vmem:[#allocation0 + $0x40] sm:$0x1]   ;;  %v67_v16 = vld [vmem:[#allocation0 + $0x41] sm:$0x1]  }
   0xf   :  { %62 = vrot.lane.b32.xlu0 %v61_v13, %s91_s0  ;;  %50 = vst.msk [vmem:[%s142_s1] sm:$0xff] %vm49_vm1, %v48_v14   ;;  %88 = vst.msk [vmem:[%s142_s1 + $0x8] sm:$0x1] %vm49_vm1, %v52_v15  }
  0x13   :  { %68 = vrot.lane.b32.xlu0 %v67_v16, %s91_s0 }
  0x81   :  { %v63_v17 = vpop.permute.xlu0 %62  }
  0x82   :  { %65 = vst.msk [vmem:[%s142_s1] sm:$0xff] %vm64_vm2, %v63_v17  }
  0x85   :  { %v69_v18 = vpop.permute.xlu0 %68  }
  0x86   :  { %89 = vst.msk [vmem:[%s142_s1 + $0x8] sm:$0x1] %vm64_vm2, %v69_v18  }

// kernel: down_forward.1
= control target key start
LH: loop header
LB: loop body
LE: loop exit
PB: predicated region body
PF: predicated region fallthrough
CT: control target
= control target key end

     0   :  { %v74_v0 = vlaneseq  ;;  %vm62_vm0 = vcmask 68608   ;;  %vm64_vm1 = vcmask 142408   ;;  %v1662_v2 = vmov 0.0   ;;  %s1663_s23 = smov 9   ;;  %s1665_s26 = smov 1   ;;  %s2097_s0 = inlined_call_operand.vmem [shape: f32[1,4,128], index: 0, kind: input, shape index: {}]   ;;  %s2098_s1 = inlined_call_operand.vmem [shape: f32[9,128], index: 1, kind: input, shape index: {}]   ;;  %s2099_s5 = inlined_call_operand.vmem [shape: f32[8,1], index: 5, kind: input, shape index: {}]   ;;  %s2100_s3 = inlined_call_operand.vmem [shape: f32[128,2], index: 3, kind: input, shape index: {}]   ;;  %s2101_s4 = inlined_call_operand.vmem [shape: bf16[8,36], index: 4, kind: input, shape index: {}]   ;;  %s2102_s2 = inlined_call_operand.vmem [shape: f32[2,128], index: 2, kind: input, shape index: {}]   ;;  %s2103_s6 = inlined_call_operand.vmem [shape: f32[8,1], index: 6, kind: input, shape index: {}]   ;;  %s2104_s7 = inlined_call_operand.vmem [shape: f32[8,1], index: 7, kind: input, shape index: {}]   ;;  %s2105_s10 = inlined_call_operand.vmem [shape: f32[8,1], index: 10, kind: input, shape index: {}]   ;;  %s2106_s9 = inlined_call_operand.vmem [shape: f32[8,1], index: 9, kind: input, shape index: {}]   ;;  %s2107_s11 = inlined_call_operand.vmem [shape: f32[8,1], index: 11, kind: input, shape index: {}]   ;;  %s2108_s8 = inlined_call_operand.vmem [shape: bf16[8,72], index: 8, kind: input, shape index: {}]   ;;  %s2109_s12 = inlined_call_operand.vmem [shape: f32[1,8,128], index: 12, kind: output, shape index: {}]  }
   0x1   :  { %v61_v1 = vld [vmem:[%s2097_s0] sm:$0xf]  ;;  %63 = vst.msk [vmem:[#allocation2] sm:$0xf] %vm62_vm0, %v1662_v2  ;;  %1268 = vmatprep.subr.bf16.mxu0 %v1662_v2  ;;  %s1664_s0 = smov 8   ;;  %s1666_s27 = smov 2  }
   0x2   :  { %65 = vst.msk [vmem:[#allocation2 + $0x8] sm:$0xf] %vm64_vm1, %v1662_v2  ;;  %67 = vrot.lane.b32.xlu0 %v61_v1, %s1663_s23  ;;  %v1755_v3 = vshrl.u32 %v74_v0, 7  ;;  %v1760_v4 = vld [vmem:[%s2098_s1] sm:$0xff]  ;;  %s1667_s28 = smov 10   ;;  %s1668_s29 = smov 17  }
   0x3   :  { %s1669_s30 = smov 16   ;;  %v1171_v17 = vld [vmem:[%s2098_s1 + $0x8] ss:$0 sm:$0xff]  ;;  %s1670_s15 = smov 18   ;;  %vm70_vm2 = vcmask 1043528   ;;  %vm1678_vm3 = vmmov 0  }
   0x4   :  { %v102_v5 = vsub.s32 3, %v1755_v3  ;;  %v82_v6 = vsub.s32 1, %v1755_v3  ;;  %v92_v7 = vsub.s32 2, %v1755_v3  ;;  %v112_v8 = vsub.s32 5, %v1755_v3  ;;  %s1671_s1 = smov 119   ;;  %s1672_s16 = smov 126   ;;  %1274 = vmatprep.mubr.msk.bf16.mxu0 %vm1678_vm3, %v1662_v2  ;;  %1310 = vmatprep.mubr.msk.f32.mxu1 %vm1678_vm3, %v1662_v2 }
   0x5   :  { %v132_v13 = vsub.s32 7, %v1755_v3  ;;  %v122_v14 = vsub.s32 6, %v1755_v3  ;;  %s1673_s17 = smov 127   ;;  %s1674_s18 = smov 120   ;;  %v1680_v58 = vmov 0   ;;  %v239_v59 = vld [vmem:[%s2099_s5] sm:$0xff] }
   0x6   :  { %v103_v9 = vrot.slane %v1760_v4, %v102_v5  ;;  %v83_v10 = vrot.slane %v1760_v4, %v82_v6  ;;  %v93_v11 = vrot.slane %v1760_v4, %v92_v7  ;;  %v113_v12 = vrot.slane %v1760_v4, %v112_v8  ;;  %s1675_s19 = smov 112   ;;  %s1676_s20 = smov 118   ;;  %1608 = vset.pattern.permute.xlu0 %v1680_v58  ;;  %v45_v61 = vld [vmem:[%s2100_s3] sm:$0xff]  ;;  %v46_v62 = vld [vmem:[%s2100_s3 + $0x8] sm:$0xff]  ;;  %v47_v0 = vld [vmem:[%s2100_s3 + $0x10] sm:$0xff] }
   0x7   :  { %v133_v15 = vrot.slane %v1760_v4, %v132_v13  ;;  %v123_v16 = vrot.slane %v1760_v4, %v122_v14  ;;  %s1677_s21 = smov 110   ;;  %s1679_s22 = smov 111   ;;  %v1681_v60 = vmov 0.0|0.0   ;;  %v1838_v63 = vpack.c.bf16 %v46_v62, %v45_v61  ;;  %v48_v1 = vld [vmem:[%s2100_s3 + $0x18] sm:$0xff]  ;;  %1609 = vset.pattern.permute.xlu1 %v1680_v58  ;;  %v49_v6 = vld [vmem:[%s2100_s3 + $0x20] sm:$0xff]  ;;  %v50_v7 = vld [vmem:[%s2100_s3 + $0x28] sm:$0xff] }
   0x8   :  { %105 = vrot.lane.b32.xlu1 %v103_v9, %s1664_s0  ;;  %85 = vrot.lane.b32.xlu0 %v83_v10, %s1665_s26  ;;  %v1847_v5 = vpack.c.bf16 %v48_v1, %v47_v0  ;;  %v1857_v8 = vpack.c.bf16 %v50_v7, %v49_v6  ;;  %v51_v9 = vld [vmem:[%s2100_s3 + $0x30] sm:$0xff]  ;;  %v52_v10 = vld [vmem:[%s2100_s3 + $0x38] sm:$0xff]  ;;  %vm158_vm4 = vcmask 1039360   ;;  %vm167_vm5 = vcmask 1031168  }
   0x9   :  { %1452 = vmatprep.subr.bf16.mxu1 %v1681_v60  ;;  %v54_v13 = vld [vmem:[%s2100_s3 + $0x48] sm:$0xff]  ;;  %vm178_vm6 = vcmask 982016   ;;  %vm230_vm7 = vcmask 1043456   ;;  %vm198_vm8 = vcmask 965632   ;;  %vm187_vm9 = vcmask 973824   ;;  %v55_v6 = vld [vmem:[%s2100_s3 + $0x50] sm:$0xff] }
   0xa   :  { %1454 = vmatpush3.bf16.msra.mxu1 %v1838_v63  ;;  %vm207_vm10 = vcmask 916480   ;;  %vm218_vm11 = vcmask 908288   ;;  %vm227_vm12 = vcmask 900096   ;;  %vm249_vm13 = vcmask 1041408   ;;  %v238_v1 = vld [vmem:[%s2101_s4] sm:$0xf] }
   0xb   :  { %1455 = vmatprep.subr.bf16.mxu1 %v1681_v60  ;;  %vm245_vm14 = vcmask 293888   ;;  %v56_v7 = vld [vmem:[%s2100_s3 + $0x58] sm:$0xff]  ;;  %vm453_vm15 = vcmask 15360   ;;  %vm658_vm1 = vcmask 146504  }
   0xc   :  { %95 = vrot.lane.b32.xlu1 %v93_v11, %s1666_s27  ;;  %115 = vrot.lane.b32.xlu0 %v113_v12, %s1667_s28  ;;  %v1867_v11 = vpack.c.bf16 %v52_v10, %v51_v9  ;;  %v53_v12 = vld [vmem:[%s2100_s3 + $0x40] sm:$0xff]  ;;  %v1928_v9 = vpack.c.bf16 %v56_v7, %v55_v6 }
   0xd   :  { %v1877_v14 = vpack.c.bf16 %v54_v13, %v53_v12  ;;  %v57_v10 = vld [vmem:[%s2100_s3 + $0x60] sm:$0xff]  ;;  %v58_v12 = vld [vmem:[%s2100_s3 + $0x68] sm:$0xff] }
   0xe   :  { %1457 = vmatpush3.bf16.msra.mxu1 %v1847_v5  ;;  %v1940_v13 = vpack.c.bf16 %v58_v12, %v57_v10 }
   0xf   :  { %1458 = vmatprep.subr.bf16.mxu1 %v1681_v60 }
  0x10   :  { %135 = vrot.lane.b32.xlu1 %v133_v15, %s1668_s29  ;;  %125 = vrot.lane.b32.xlu0 %v123_v16, %s1669_s30  ;;  %v1883_v16 = vsub.s32 0, %v1755_v3 }
  0x12   :  { %1460 = vmatpush3.bf16.msra.mxu1 %v1857_v8 }
  0x13   :  { %1461 = vmatprep.subr.bf16.mxu1 %v1681_v60 }
  0x14   :  { %145 = vrot.lane.b32.xlu1 %v1171_v17, %s1670_s15 }
  0x16   :  { %1463 = vmatpush3.bf16.msra.mxu1 %v1867_v11 }
  0x17   :  { %1464 = vmatprep.subr.bf16.mxu1 %v1681_v60 }
  0x1a   :  { %1466 = vmatpush3.bf16.msra.mxu1 %v1877_v14 }
  0x1b   :  { %1467 = vmatprep.subr.bf16.mxu1 %v1681_v60 }
  0x1e   :  { %1469 = vmatpush3.bf16.msra.mxu1 %v1928_v9 }
  0x1f   :  { %1470 = vmatprep.subr.bf16.mxu1 %v1681_v60 }
  0x22   :  { %1472 = vmatpush3.bf16.msra.mxu1 %v1940_v13 }
  0x23   :  { %1473 = vmatprep.subr.bf16.mxu1 %v1681_v60 }
  0x74   :  { %v68_v18 = vpop.permute.xlu0 %67 }
  0x75   :  { %71 = vst.msk [vmem:[#allocation2] sm:$0xf] %vm70_vm2, %v68_v18 }
  0x76   :  { %72 = vst.msk [vmem:[#allocation2 + $0x8] sm:$0xf] %vm62_vm0, %v68_v18  ;;  %vm656_vm0 = vcmask 72704  }
  0x7a   :  { %v1778_v19 = vpop.permute.xlu1 %105  ;;  %v1780_v20 = vpop.permute.xlu0 %85 }
  0x7c   :  { %v1782_v21 = vld [vmem:[#allocation2] sm:$0xf] }
  0x7d   :  { %v79_v22 = vld [vmem:[#allocation2 + $0x8] sm:$0xf]  ;;  %v88_v23 = vmul.f32 %v1780_v20, %v1782_v21  ;;  %v108_v25 = vmul.f32 %v1778_v19, %v1782_v21  ;;  %657 = vst.msk [vmem:[#allocation2] sm:$0xff] %vm656_vm0, %v1662_v2 }
  0x7e   :  { %v89_v24 = vmul.f32 %v1780_v20, %v79_v22  ;;  %v109_v26 = vmul.f32 %v1778_v19, %v79_v22  ;;  %v1790_v27 = vpop.permute.xlu1 %95  ;;  %v1792_v28 = vpop.permute.xlu0 %115  ;;  %v1568_v29 = vpack.i.bf16 %v79_v22, %v1782_v21  ;;  %659 = vst.msk [vmem:[#allocation2 + $0x8] sm:$0xff] %vm658_vm1, %v1662_v2 }
  0x7f   :  { %v98_v30 = vmul.f32 %v1790_v27, %v1782_v21  ;;  %v99_v31 = vmul.f32 %v1790_v27, %v79_v22  ;;  %v152_v32 = vrot.slane %v88_v23, 4  ;;  %v118_v34 = vmul.f32 %v1792_v28, %v1782_v21 }
  0x80   :  { %1569 = vrot.lane.b32.xlu1 %v1568_v29, %s1671_s1  ;;  %v153_v33 = vrot.slane %v89_v24, 4  ;;  %v119_v36 = vmul.f32 %v1792_v28, %v79_v22  ;;  %v172_v40 = vrot.slane %v108_v25, 4  ;;  %v173_v41 = vrot.slane %v109_v26, 4 }
  0x81   :  { %v1573_v35 = vpack.i.bf16 %v99_v31, %v98_v30  ;;  %v192_v45 = vrot.slane %v118_v34, 4  ;;  %v1887_v26 = vrot.slane %v1760_v4, %v1883_v16 }
  0x82   :  { %v1802_v37 = vpop.permute.xlu1 %135  ;;  %v1804_v38 = vpop.permute.xlu0 %125  ;;  %v1583_v39 = vpack.i.bf16 %v153_v33, %v152_v32  ;;  %v1588_v49 = vpack.i.bf16 %v173_v41, %v172_v40  ;;  %v193_v50 = vrot.slane %v119_v36, 4 }
  0x83   :  { %v128_v42 = vmul.f32 %v1804_v38, %v1782_v21  ;;  %v129_v43 = vmul.f32 %v1804_v38, %v79_v22  ;;  %v138_v46 = vmul.f32 %v1802_v37, %v1782_v21  ;;  %v139_v47 = vmul.f32 %v1802_v37, %v79_v22 }
  0x84   :  { %1574 = vrot.lane.b32.xlu1 %v1573_v35, %s1672_s16  ;;  %1584 = vrot.lane.b32.xlu0 %v1583_v39, %s1673_s17  ;;  %v1593_v54 = vpack.i.bf16 %v193_v50, %v192_v45  ;;  %v78_v33 = vmul.f32 %v1887_v26, %v1782_v21 }
  0x85   :  { %v1578_v44 = vpack.i.bf16 %v129_v43, %v128_v42  ;;  %v212_v55 = vrot.slane %v138_v46, 4  ;;  %v213_v56 = vrot.slane %v139_v47, 4 }
  0x86   :  { %v1814_v48 = vpop.permute.xlu1 %145 }
  0x87   :  { %v148_v51 = vmul.f32 %v1814_v48, %v1782_v21  ;;  %v149_v52 = vmul.f32 %v1814_v48, %v79_v22  ;;  %v1598_v57 = vpack.i.bf16 %v213_v56, %v212_v55 }
  0x88   :  { %1589 = vrot.lane.b32.xlu0 %v1588_v49, %s1674_s18  ;;  %1579 = vrot.lane.b32.xlu1 %v1578_v44, %s1675_s19 }
  0x89   :  { %v1603_v53 = vpack.i.bf16 %v149_v52, %v148_v51 }
  0x8c   :  { %1594 = vrot.lane.b32.xlu0 %v1593_v54, %s1676_s20  ;;  %1604 = vrot.lane.b32.xlu1 %v1603_v53, %s1677_s21 }
  0x90   :  { %1599 = vrot.lane.b32.xlu0 %v1598_v57, %s1679_s22 }
  0x94   :  { %242 = vperm.xlu0 %1608, %v239_v59  }
  0xf2   :  { %v1570_v15 = vpop.permute.xlu1 %1569 }
  0xf3   :  { %v1572_v43 = vunpack.i.h.bf16 %v1570_v15  ;;  %v1571_v44 = vunpack.i.l.bf16 %v1570_v15  ;;  %v59_v15 = vld [vmem:[%s2100_s3 + $0x70] sm:$0xff] }
  0xf5   :  { %v188_v54 = vsel %vm187_vm9, %v1571_v44, %v1572_v43  ;;  %v1971_v44 = vld [vmem:[%s2102_s2] sm:$0x3] }
  0xf6   :  { %v1575_v17 = vpop.permute.xlu1 %1574  ;;  %v1585_v18 = vpop.permute.xlu0 %1584 }
  0xf7   :  { %v1587_v22 = vunpack.i.h.bf16 %v1585_v18  ;;  %v1586_v23 = vunpack.i.l.bf16 %v1585_v18  ;;  %v1577_v24 = vunpack.i.h.bf16 %v1575_v17  ;;  %v1576_v25 = vunpack.i.l.bf16 %v1575_v17  ;;  %v60_v17 = vld [vmem:[%s2100_s3 + $0x78] sm:$0xff] }
  0xf8   :  { %v1950_v18 = vpack.c.bf16 %v60_v17, %v59_v15 }
  0xf9   :  { %v159_v3 = vsel %vm158_vm4, %v1586_v23, %v1587_v22  ;;  %v168_v34 = vsel %vm167_vm5, %v1576_v25, %v1577_v24 }
  0xfa   :  { %v1580_v29 = vpop.permute.xlu1 %1579  ;;  %v1590_v30 = vpop.permute.xlu0 %1589  ;;  %v231_v42 = vsel %vm230_vm7, %v78_v33, %v159_v3  ;;  %1475 = vmatpush3.bf16.msra.mxu1 %v1950_v18 }
  0xfb   :  { %v1592_v31 = vunpack.i.h.bf16 %v1590_v30  ;;  %v1591_v32 = vunpack.i.l.bf16 %v1590_v30  ;;  %v1582_v46 = vunpack.i.h.bf16 %v1580_v29  ;;  %v1581_v47 = vunpack.i.l.bf16 %v1580_v29  ;;  %1353 = vmatprep.subr.mxu1 %v1662_v2 }
  0xfd   :  { %v179_v35 = vsel %vm178_vm6, %v1591_v32, %v1592_v31  ;;  %v208_v55 = vsel %vm207_vm10, %v1581_v47, %v1582_v46  ;;  %v620_v46 = vld [vmem:[%s2104_s7] sm:$0xff] }
  0xfe   :  { %v1605_v36 = vpop.permute.xlu1 %1604  ;;  %v1595_v4 = vpop.permute.xlu0 %1594  ;;  %v232_v39 = vsel %vm230_vm7, %v168_v34, %v179_v35 }
  0xff   :  { %v1597_v40 = vunpack.i.h.bf16 %v1595_v4  ;;  %v1596_v41 = vunpack.i.l.bf16 %v1595_v4  ;;  %v235_v45 = vpack.c.bf16 %v232_v39, %v231_v42  ;;  %v1607_v49 = vunpack.i.h.bf16 %v1605_v36 }
 0x100   :  { %v1606_v21 = vunpack.i.l.bf16 %v1605_v36 }
 0x101   :  { %1269 = vmatpush3.bf16.msra.mxu0 %v235_v45  ;;  %v199_v51 = vsel %vm198_vm8, %v1596_v41, %v1597_v40  ;;  %v613_v45 = vld [vmem:[%s2103_s6] sm:$0xff] }
 0x102   :  { %v1600_v50 = vpop.permute.xlu0 %1599  ;;  %1270 = vmatprep.subr.bf16.mxu0 %v1662_v2  ;;  %v228_v57 = vsel %vm227_vm12, %v1606_v21, %v1607_v49  ;;  %v233_v58 = vsel %vm230_vm7, %v188_v54, %v199_v51  ;;  %616 = vperm.xlu1 %1609, %v613_v45  }
 0x103   :  { %v1602_v52 = vunpack.i.h.bf16 %v1600_v50  ;;  %v1601_v53 = vunpack.i.l.bf16 %v1600_v50  ;;  %v237_v62 = vpack.c.bf16 %v228_v57, %v228_v57 }
 0x105   :  { %v219_v56 = vsel %vm218_vm11, %v1601_v53, %v1602_v52  ;;  %v251_v0 = vsel %vm249_vm13, %v237_v62, 0 }
 0x106   :  { %v234_v59 = vsel %vm230_vm7, %v208_v55, %v219_v56  ;;  %623 = vperm.xlu1 %1609, %v620_v46  }
 0x107   :  { %v236_v61 = vpack.c.bf16 %v234_v59, %v233_v58 }
 0x109   :  { %1271 = vmatpush3.bf16.msra.mxu0 %v236_v61 }
 0x10a   :  { %1272 = vmatprep.subr.bf16.mxu0 %v1662_v2 }
 0x10d   :  { %1273 = vmatpush3.bf16.msra.mxu0 %v251_v0 }
 0x10e   :  { %1476 = vmatprep.subr.bf16.mxu0 %v1681_v60 }
 0x110   :  { %1275 = vmatmul.mubr.msk.bf16.vlgmr.msra.gmra.mrb[0].mxu0 %vm245_vm14, %v238_v1  ;;  %vm664_vm14 = vcmask 1047624  }
 0x111   :  { %1478 = vmatpush3.bf16.msra.mxu0 %v1838_v63  ;;  %1345 = vmatprep.mubr.msk.f32.mxu0 %vm1678_vm3, %v1662_v2 }
 0x112   :  { %1479 = vmatprep.subr.bf16.mxu0 %v1681_v60 }
 0x113   :  { %v243_v22 = vpop.permute.xlu0 %242 }
 0x115   :  { %1481 = vmatpush3.bf16.msra.mxu0 %v1847_v5 }
 0x116   :  { %1482 = vmatprep.subr.bf16.mxu0 %v1681_v60 }
 0x119   :  { %1484 = vmatpush3.bf16.msra.mxu0 %v1857_v8 }
 0x11a   :  { %1485 = vmatprep.subr.bf16.mxu0 %v1681_v60 }
 0x11d   :  { %1487 = vmatpush3.bf16.msra.mxu0 %v1867_v11 }
 0x11e   :  { %1488 = vmatprep.subr.bf16.mxu0 %v1681_v60 }
 0x121   :  { %1490 = vmatpush3.bf16.msra.mxu0 %v1877_v14 }
 0x122   :  { %1491 = vmatprep.subr.bf16.mxu0 %v1681_v60 }
 0x125   :  { %1493 = vmatpush3.bf16.msra.mxu0 %v1928_v9 }
 0x126   :  { %1494 = vmatprep.subr.bf16.mxu0 %v1681_v60 }
 0x129   :  { %1496 = vmatpush3.bf16.msra.mxu0 %v1940_v13 }
 0x12a   :  { %1497 = vmatprep.subr.bf16.mxu0 %v1681_v60 }
 0x12d   :  { %1499 = vmatpush3.bf16.msra.mxu0 %v1950_v18 }
 0x12e   :  { %1348 = vmatprep.subr.mxu0 %v1662_v2 }
 0x181   :  { %v617_v62 = vpop.permute.xlu1 %616 }
 0x185   :  { %v624_v15 = vpop.permute.xlu1 %623 }
 0x1e3   :  { %v287_v23 = vpop.f32.mrb[0].mxu0 }
 0x1e4   :  { %v1958_v24 = vadd.f32 %v287_v23, %v243_v22  ;;  %v1276_v25 = vpop.f32.mrb[1].mxu0 }
 0x1e5   :  { %v290_v29 = vpop.f32.mrb[2].mxu0 }
 0x1e6   :  { %v293_v30 = vrot.slane %v1958_v24, 4  ;;  %v299_v31 = vmul.f32 %v1958_v24, %v1958_v24  ;;  %v1277_v32 = vpop.f32.mrb[3].mxu0 }
 0x1e8   :  { %v300_v3 = vrot.slane %v299_v31, 4  ;;  %v294_v33 = vadd.f32 %v293_v30, %v1958_v24 }
 0x1ea   :  { %v301_v34 = vadd.f32 %v300_v3, %v299_v31  ;;  %v295_v35 = vrot.slane %v294_v33, 2 }
 0x1ec   :  { %v296_v36 = vadd.f32 %v295_v35, %v294_v33  ;;  %v302_v4 = vrot.slane %v301_v34, 2 }
 0x1ee   :  { %v297_v39 = vrot.slane %v296_v36, 1  ;;  %v303_v40 = vadd.f32 %v302_v4, %v301_v34 }
 0x1f0   :  { %v298_v41 = vadd.f32 %v297_v39, %v296_v36  ;;  %v304_v42 = vrot.slane %v303_v40, 1 }
 0x1f2   :  { %1311 = vmatmul.mubr.f32.vlgmr.msra.gmra.mrb[0].mxu1 %v298_v41  ;;  %v305_v43 = vadd.f32 %v304_v42, %v303_v40 }
 0x1f3   :  { %1355 = vmatprep.mubr.msk.f32.mxu1 %vm1678_vm3, %v1662_v2  ;;  %1354 = vmatpush3.msk.msra.mxu1 %vm249_vm13, %v1971_v44 }
 0x1f4   :  { %1346 = vmatmul.mubr.f32.vlgmr.msra.gmra.mrb[4].mxu0 %v305_v43  ;;  %1358 = vmatprep.subr.bf16.mxu1 %v1662_v2 }
 0x1f5   :  { %1350 = vmatprep.mubr.msk.f32.mxu0 %vm1678_vm3, %v1662_v2  ;;  %1349 = vmatpush3.msk.msra.mxu0 %vm249_vm13, %v1971_v44 }
 0x1f6   :  { %1500 = vmatprep.subr.bf16.mxu0 %v1681_v60 }
 0x2c5   :  { %v372_v47 = vpop.f32.mrb[0].mxu1 }
 0x2c6   :  { %v446_v49 = vmul.f32 0.001953125, %v372_v47  ;;  %v1312_v21 = vpop.f32.mrb[1].mxu1 }
 0x2c7   :  { %v442_v50 = vpop.f32.mrb[4].mxu0 }
 0x2c8   :  { %v448_v51 = vmul.f32 %v446_v49, %v446_v49  ;;  %v447_v52 = vmul.f32 0.001953125, %v442_v50  ;;  %v1347_v53 = vpop.f32.mrb[5].mxu0  ;;  %1351 = vmatmul.mubr.msk.f32.vlgmr.msra.gmra.mrb[6].mxu0 %vm453_vm15, %v446_v49 }
 0x2c9   :  { %1502 = vmatpush3.bf16.msra.mxu0 %v1838_v63  ;;  %1404 = vmatprep.mubr.msk.f32.mxu0 %vm1678_vm3, %v1662_v2 }
 0x2ca   :  { %v449_v54 = vsub.f32 %v447_v52, %v448_v51  ;;  %1503 = vmatprep.subr.bf16.mxu0 %v1681_v60 }
 0x2cc   :  { %v450_v55 = vmax.f32 %v449_v54, 0.0 }
 0x2cd   :  { %1505 = vmatpush3.bf16.msra.mxu0 %v1847_v5 }
 0x2ce   :  { %v451_v56 = vadd.f32 1e-05, %v450_v55  ;;  %1506 = vmatprep.subr.bf16.mxu0 %v1681_v60 }
 0x2d0   :  { %1650 = vrsqrt.f32 %v451_v56 }
 0x2d1   :  { %1508 = vmatpush3.bf16.msra.mxu0 %v1857_v8 }
 0x2d2   :  { %1509 = vmatprep.subr.bf16.mxu0 %v1681_v60 }
 0x2d5   :  { %1511 = vmatpush3.bf16.msra.mxu0 %v1867_v11 }
 0x2d6   :  { %1512 = vmatprep.subr.bf16.mxu0 %v1681_v60 }
 0x2d9   :  { %1514 = vmatpush3.bf16.msra.mxu0 %v1877_v14 }
 0x2da   :  { %v1651_v57 = vpop.eup %1650  ;;  %1515 = vmatprep.subr.bf16.mxu0 %v1681_v60 }
 0x2db   :  { %1356 = vmatmul.mubr.msk.f32.vlgmr.msra.gmra.mrb[2].mxu1 %vm453_vm15, %v1651_v57 }
 0x2dc   :  { %1368 = vmatprep.mubr.msk.bf16.mxu1 %vm1678_vm3, %v1662_v2 }
 0x2dd   :  { %1517 = vmatpush3.bf16.msra.mxu0 %v1928_v9 }
 0x2de   :  { %1518 = vmatprep.subr.bf16.mxu0 %v1681_v60 }
 0x2e1   :  { %1520 = vmatpush3.bf16.msra.mxu0 %v1940_v13 }
 0x2e2   :  { %1521 = vmatprep.subr.bf16.mxu0 %v1681_v60 }
 0x2e5   :  { %1523 = vmatpush3.bf16.msra.mxu0 %v1950_v18 }
 0x2e6   :  { %1442 = vmatprep.subr.mxu0 %v1662_v2 }
 0x39b   :  { %v526_v58 = vpop.f32.mrb[6].mxu0 }
 0x39c   :  { %v1352_v59 = vpop.f32.mrb[7].mxu0  ;;  %v606_v61 = vrot.slane %v526_v58, %v1883_v16 }
 0x39e   :  { %v607_v1 = vsub.f32 %v1958_v24, %v606_v61 }
 0x3ae   :  { %v599_v0 = vpop.f32.mrb[2].mxu1 }
 0x3af   :  { %v611_v6 = vrot.slane %v599_v0, %v1883_v16  ;;  %v1357_v7 = vpop.f32.mrb[3].mxu1 }
 0x3b1   :  { %v612_v10 = vmul.f32 %v611_v6, %v607_v1 }
 0x3b3   :  { %v619_v12 = vmul.f32 %v617_v62, %v612_v10 }
 0x3b5   :  { %v626_v17 = vadd.f32 %v624_v15, %v619_v12 }
 0x3b7   :  { %v627_v22 = vmul.f32 0.70710677, %v626_v17  ;;  %v653_v51 = vmul.f32 0.5, %v626_v17 }
 0x3b9   :  { %v628_v23 = vand.u32 2147483647, %v627_v22  ;;  %vm650_vm2 = vcmp.ge.f32.partialorder %v627_v22, 0.0 }
 0x3bb   :  { %v629_v25 = vmul.f32 0.3275911, %v628_v23  ;;  %v644_v32 = vsub.f32 0.0, %v628_v23 }
 0x3bd   :  { %v630_v29 = vadd.f32 1.0, %v629_v25  ;;  %v645_v34 = vmul.f32 %v644_v32, %v628_v23 }
 0x3bf   :  { %1652 = vrcp.f32 %v630_v29  ;;  %v646_v36 = vmul.f32 1.442695, %v645_v34 }
 0x3c1   :  { %1654 = vpow2.f32 %v646_v36 }
 0x3c9   :  { %v1653_v30 = vpop.eup %1652 }
 0x3ca   :  { %v632_v31 = vmul.f32 %v1653_v30, %v630_v29 }
 0x3cb   :  { %v1655_v46 = vpop.eup %1654 }
 0x3cc   :  { %v633_v3 = vsub.f32 2.0, %v632_v31 }
 0x3ce   :  { %v634_v33 = vmul.f32 %v1653_v30, %v633_v3  ;;  %v754_v30 = vld [vmem:[%s2106_s9] sm:$0xff] }
 0x3d0   :  { %v635_v35 = vmul.f32 1.0614054, %v634_v33 }
 0x3d2   :  { %v636_v24 = vadd.f32 -1.4531521, %v635_v35 }
 0x3d4   :  { %v637_v4 = vmul.f32 %v636_v24, %v634_v33 }
 0x3d6   :  { %v638_v39 = vadd.f32 1.4214138, %v637_v4 }
 0x3d8   :  { %v639_v40 = vmul.f32 %v638_v39, %v634_v33 }
 0x3da   :  { %v640_v41 = vadd.f32 -0.28449672, %v639_v40 }
 0x3dc   :  { %v641_v42 = vmul.f32 %v640_v41, %v634_v33 }
 0x3de   :  { %v642_v43 = vadd.f32 0.2548296, %v641_v42 }
 0x3e0   :  { %v643_v45 = vmul.f32 %v642_v43, %v634_v33 }
 0x3e2   :  { %v648_v47 = vmul.f32 %v1655_v46, %v643_v45 }
 0x3e4   :  { %v649_v49 = vsub.f32 1.0, %v648_v47 }
 0x3e6   :  { %v651_v21 = vsub.f32 0.0, %v649_v49 }
 0x3e8   :  { %v652_v50 = vsel %vm650_vm2, %v649_v49, %v651_v21 }
 0x3e9   :  { %v654_v52 = vadd.f32 1.0, %v652_v50 }
 0x3eb   :  { %v655_v53 = vmul.f32 %v654_v52, %v653_v51 }
 0x3ed   :  { %661 = vrot.lane.b32.xlu0 %v655_v53, %s1663_s23 }
 0x45f   :  { %v662_v54 = vpop.permute.xlu0 %661 }
 0x460   :  { %665 = vst.msk [vmem:[#allocation2] sm:$0xff] %vm664_vm14, %v662_v54 }
 0x461   :  { %666 = vst.msk [vmem:[#allocation2 + $0x8] sm:$0xff] %vm656_vm0, %v662_v54 }
 0x467   :  { %v667_v55 = vld [vmem:[#allocation2] sm:$0xff] }
 0x468   :  { %v669_v56 = vld [vmem:[#allocation2 + $0x8] sm:$0xff]  ;;  %v672_v57 = vmul.f32 %v667_v55, %v1790_v27  ;;  %v670_v59 = vmul.f32 %v667_v55, %v1780_v20  ;;  %v674_v1 = vmul.f32 %v667_v55, %v1778_v19  ;;  %v678_v10 = vmul.f32 %v667_v55, %v1804_v38 }
 0x469   :  { %v673_v58 = vmul.f32 %v669_v56, %v1790_v27  ;;  %v671_v61 = vmul.f32 %v669_v56, %v1780_v20  ;;  %v675_v6 = vmul.f32 %v669_v56, %v1778_v19  ;;  %v1620_v7 = vpack.i.bf16 %v669_v56, %v667_v55 }
 0x46a   :  { %v679_v27 = vmul.f32 %v669_v56, %v1804_v38  ;;  %v676_v15 = vmul.f32 %v667_v55, %v1792_v28  ;;  %v677_v20 = vmul.f32 %v669_v56, %v1792_v28  ;;  %v682_v19 = vmul.f32 %v667_v55, %v1814_v48 }
 0x46b   :  { %v1615_v62 = vpack.i.bf16 %v673_v58, %v672_v57  ;;  %v1610_v0 = vpack.i.bf16 %v671_v61, %v670_v59  ;;  %v1625_v12 = vpack.i.bf16 %v675_v6, %v674_v1  ;;  %v683_v17 = vmul.f32 %v669_v56, %v1814_v48  ;;  %v1123_v48 = vld [vmem:[%s2105_s10] sm:$0xff] }
 0x46c   :  { %v1635_v22 = vpack.i.bf16 %v679_v27, %v678_v10  ;;  %v1630_v23 = vpack.i.bf16 %v677_v20, %v676_v15  ;;  %v680_v25 = vmul.f32 %v667_v55, %v1802_v37  ;;  %v681_v29 = vmul.f32 %v669_v56, %v1802_v37  ;;  %v1130_v37 = vld [vmem:[%s2107_s11] sm:$0xff] }
 0x46d   :  { %1616 = vrot.lane.b32.xlu0 %v1615_v62, %s1672_s16  ;;  %1611 = vrot.lane.b32.xlu1 %v1610_v0, %s1673_s17  ;;  %v1645_v38 = vpack.i.bf16 %v683_v17, %v682_v19  ;;  %v668_v34 = vmul.f32 %v667_v55, %v1887_v26  ;;  %v753_v15 = vld [vmem:[%s2108_s8] sm:$0xf] }
 0x46e   :  { %v1640_v28 = vpack.i.bf16 %v681_v29, %v680_v25 }
 0x471   :  { %1621 = vrot.lane.b32.xlu0 %v1620_v7, %s1671_s1  ;;  %1626 = vrot.lane.b32.xlu1 %v1625_v12, %s1674_s18 }
 0x475   :  { %1636 = vrot.lane.b32.xlu0 %v1635_v22, %s1675_s19  ;;  %1631 = vrot.lane.b32.xlu1 %v1630_v23, %s1676_s20 }
 0x479   :  { %1646 = vrot.lane.b32.xlu0 %v1645_v38, %s1677_s21  ;;  %1641 = vrot.lane.b32.xlu1 %v1640_v28, %s1679_s22 }
 0x47d   :  { %1126 = vperm.xlu0 %1608, %v1123_v48   ;;  %757 = vperm.xlu1 %1609, %v754_v30  }
 0x481   :  { %1133 = vperm.xlu1 %1609, %v1130_v37  }
 0x4df   :  { %v1617_v31 = vpop.permute.xlu0 %1616  ;;  %v1612_v32 = vpop.permute.xlu1 %1611 }
 0x4e0   :  { %v1614_v3 = vunpack.i.h.bf16 %v1612_v32  ;;  %v1613_v33 = vunpack.i.l.bf16 %v1612_v32  ;;  %v1619_v35 = vunpack.i.h.bf16 %v1617_v31  ;;  %v1618_v24 = vunpack.i.l.bf16 %v1617_v31 }
 0x4e2   :  { %v690_v36 = vsel %vm158_vm4, %v1613_v33, %v1614_v3  ;;  %v698_v43 = vsel %vm167_vm5, %v1618_v24, %v1619_v35  ;;  %vm760_vm4 = vcmask 588800  }
 0x4e3   :  { %v748_v4 = vpack.c.bf16 %v690_v36, %v668_v34  ;;  %v1622_v39 = vpop.permute.xlu0 %1621  ;;  %v1627_v40 = vpop.permute.xlu1 %1626 }
 0x4e4   :  { %v1629_v41 = vunpack.i.h.bf16 %v1627_v40  ;;  %v1628_v42 = vunpack.i.l.bf16 %v1627_v40  ;;  %v1624_v45 = vunpack.i.h.bf16 %v1622_v39  ;;  %v1623_v46 = vunpack.i.l.bf16 %v1622_v39 }
 0x4e5   :  { %1359 = vmatpush3.bf16.msra.mxu1 %v748_v4 }
 0x4e6   :  { %v706_v47 = vsel %vm178_vm6, %v1628_v42, %v1629_v41  ;;  %1360 = vmatprep.subr.bf16.mxu1 %v1662_v2  ;;  %v714_v52 = vsel %vm187_vm9, %v1623_v46, %v1624_v45 }
 0x4e7   :  { %v749_v49 = vpack.c.bf16 %v706_v47, %v698_v43  ;;  %v1637_v26 = vpop.permute.xlu0 %1636  ;;  %v1632_v21 = vpop.permute.xlu1 %1631 }
 0x4e8   :  { %v1634_v50 = vunpack.i.h.bf16 %v1632_v21  ;;  %v1633_v51 = vunpack.i.l.bf16 %v1632_v21  ;;  %v1639_v53 = vunpack.i.h.bf16 %v1637_v26  ;;  %v1638_v54 = vunpack.i.l.bf16 %v1637_v26 }
 0x4e9   :  { %1361 = vmatpush3.bf16.msra.mxu1 %v749_v49 }
 0x4ea   :  { %v722_v55 = vsel %vm198_vm8, %v1633_v51, %v1634_v50  ;;  %1362 = vmatprep.subr.bf16.mxu1 %v1662_v2  ;;  %v730_v1 = vsel %vm207_vm10, %v1638_v54, %v1639_v53 }
 0x4eb   :  { %v750_v56 = vpack.c.bf16 %v722_v55, %v714_v52  ;;  %v1647_v57 = vpop.permute.xlu0 %1646  ;;  %v1642_v58 = vpop.permute.xlu1 %1641 }
 0x4ec   :  { %v1649_v59 = vunpack.i.h.bf16 %v1647_v57  ;;  %v1648_v61 = vunpack.i.l.bf16 %v1647_v57  ;;  %v1644_v62 = vunpack.i.h.bf16 %v1642_v58  ;;  %v1643_v0 = vunpack.i.l.bf16 %v1642_v58 }
 0x4ed   :  { %1363 = vmatpush3.bf16.msra.mxu1 %v750_v56 }
 0x4ee   :  { %v738_v6 = vsel %vm218_vm11, %v1643_v0, %v1644_v62  ;;  %1364 = vmatprep.subr.bf16.mxu1 %v1662_v2  ;;  %v746_v7 = vsel %vm227_vm12, %v1648_v61, %v1649_v59 }
 0x4ef   :  { %v751_v10 = vpack.c.bf16 %v738_v6, %v730_v1  ;;  %v752_v12 = vpack.c.bf16 %v746_v7, %v746_v7 }
 0x4f1   :  { %1365 = vmatpush3.bf16.msra.mxu1 %v751_v10  ;;  %v765_v27 = vsel %vm230_vm7, %v752_v12, 0 }
 0x4f2   :  { %1366 = vmatprep.subr.bf16.mxu1 %v1662_v2 }
 0x4f5   :  { %1367 = vmatpush3.bf16.msra.mxu1 %v765_v27 }
 0x4f6   :  { %1524 = vmatprep.subr.bf16.mxu1 %v1681_v60 }
 0x4f8   :  { %1369 = vmatmul.mubr.msk.bf16.vlgmr.msra.gmra.mrb[4].mxu1 %vm760_vm4, %v753_v15 }
 0x4f9   :  { %1526 = vmatpush3.bf16.msra.mxu1 %v1838_v63  ;;  %1439 = vmatprep.mubr.msk.f32.mxu1 %vm1678_vm3, %v1662_v2 }
 0x4fa   :  { %1527 = vmatprep.subr.bf16.mxu1 %v1681_v60 }
 0x4fc   :  { %v758_v63 = vpop.permute.xlu1 %757  ;;  %v1127_v47 = vpop.permute.xlu0 %1126 }
 0x4fd   :  { %1529 = vmatpush3.bf16.msra.mxu1 %v1847_v5 }
 0x4fe   :  { %1530 = vmatprep.subr.bf16.mxu1 %v1681_v60 }
 0x501   :  { %1532 = vmatpush3.bf16.msra.mxu1 %v1857_v8 }
 0x502   :  { %1533 = vmatprep.subr.bf16.mxu1 %v1681_v60 }
 0x505   :  { %1535 = vmatpush3.bf16.msra.mxu1 %v1867_v11 }
 0x506   :  { %1536 = vmatprep.subr.bf16.mxu1 %v1681_v60 }
 0x509   :  { %1538 = vmatpush3.bf16.msra.mxu1 %v1877_v14 }
 0x50a   :  { %1539 = vmatprep.subr.bf16.mxu1 %v1681_v60 }
 0x50d   :  { %1541 = vmatpush3.bf16.msra.mxu1 %v1928_v9 }
 0x50e   :  { %1542 = vmatprep.subr.bf16.mxu1 %v1681_v60 }
 0x511   :  { %1544 = vmatpush3.bf16.msra.mxu1 %v1940_v13 }
 0x512   :  { %1545 = vmatprep.subr.bf16.mxu1 %v1681_v60 }
 0x515   :  { %1547 = vmatpush3.bf16.msra.mxu1 %v1950_v18 }
 0x5cb   :  { %v801_v5 = vpop.f32.mrb[4].mxu1 }
 0x5cc   :  { %v802_v8 = vadd.f32 %v801_v5, %v758_v63  ;;  %v1370_v11 = vpop.f32.mrb[5].mxu1 }
 0x5cd   :  { %v804_v20 = vpop.f32.mrb[6].mxu1 }
 0x5ce   :  { %v807_v19 = vrot.slane %v802_v8, 4  ;;  %v813_v17 = vmul.f32 %v802_v8, %v802_v8  ;;  %v1371_v14 = vpop.f32.mrb[7].mxu1 }
 0x5d0   :  { %v808_v22 = vadd.f32 %v807_v19, %v802_v8  ;;  %v814_v23 = vrot.slane %v813_v17, 4 }
 0x5d2   :  { %v809_v25 = vrot.slane %v808_v22, 2  ;;  %v815_v9 = vadd.f32 %v814_v23, %v813_v17 }
 0x5d4   :  { %v810_v29 = vadd.f32 %v809_v25, %v808_v22  ;;  %v816_v38 = vrot.slane %v815_v9, 2 }
 0x5d6   :  { %v811_v28 = vrot.slane %v810_v29, 1  ;;  %v817_v13 = vadd.f32 %v816_v38, %v815_v9 }
 0x5d8   :  { %v812_v48 = vadd.f32 %v811_v28, %v810_v29  ;;  %v818_v60 = vrot.slane %v817_v13, 1 }
 0x5da   :  { %1405 = vmatmul.mubr.f32.vlgmr.msra.gmra.mrb[8].mxu0 %v812_v48  ;;  %v819_v18 = vadd.f32 %v818_v60, %v817_v13 }
 0x5db   :  { %1443 = vmatpush3.msk.msra.mxu0 %vm249_vm13, %v1971_v44  ;;  %1444 = vmatprep.mubr.msk.f32.mxu0 %vm1678_vm3, %v1662_v2 }
 0x5dc   :  { %1440 = vmatmul.mubr.f32.vlgmr.msra.gmra.mrb[8].mxu1 %v819_v18  ;;  %1447 = vmatprep.subr.mxu0 %v1662_v2 }
 0x6ad   :  { %v886_v30 = vpop.f32.mrb[8].mxu0 }
 0x6ae   :  { %v960_v37 = vmul.f32 0.001953125, %v886_v30  ;;  %v1406_v31 = vpop.f32.mrb[9].mxu0 }
 0x6af   :  { %v956_v32 = vpop.f32.mrb[8].mxu1 }
 0x6b0   :  { %v962_v3 = vmul.f32 %v960_v37, %v960_v37  ;;  %v961_v33 = vmul.f32 0.001953125, %v956_v32  ;;  %v1441_v34 = vpop.f32.mrb[9].mxu1  ;;  %1445 = vmatmul.mubr.msk.f32.vlgmr.msra.gmra.mrb[10].mxu0 %vm453_vm15, %v960_v37 }
 0x6b1   :  { %1448 = vmatpush3.msk.msra.mxu0 %vm249_vm13, %v1971_v44  ;;  %1449 = vmatprep.mubr.msk.f32.mxu0 %vm1678_vm3, %v1662_v2  ;;  %v1134_v2 = vpop.permute.xlu1 %1133 }
 0x6b2   :  { %v963_v35 = vsub.f32 %v961_v33, %v962_v3 }
 0x6b4   :  { %v964_v24 = vmax.f32 %v963_v35, 0.0 }
 0x6b6   :  { %v965_v36 = vadd.f32 1e-05, %v964_v24 }
 0x6b8   :  { %1656 = vrsqrt.f32 %v965_v36 }
 0x6c2   :  { %v1657_v4 = vpop.eup %1656 }
 0x6c3   :  { %1450 = vmatmul.mubr.msk.f32.vlgmr.msra.gmra.mrb[12].mxu0 %vm453_vm15, %v1657_v4 }
 0x783   :  { %v1036_v39 = vpop.f32.mrb[10].mxu0 }
 0x784   :  { %v1446_v40 = vpop.f32.mrb[11].mxu0  ;;  %v1116_v41 = vrot.slane %v1036_v39, %v1883_v16 }
 0x786   :  { %v1117_v43 = vsub.f32 %v802_v8, %v1116_v41 }
 0x796   :  { %v1109_v42 = vpop.f32.mrb[12].mxu0 }
 0x797   :  { %v1121_v45 = vrot.slane %v1109_v42, %v1883_v16  ;;  %v1451_v46 = vpop.f32.mrb[13].mxu0 }
 0x799   :  { %v1122_v44 = vmul.f32 %v1121_v45, %v1117_v43 }
 0x79b   :  { %v1129_v49 = vmul.f32 %v1127_v47, %v1122_v44 }
 0x79d   :  { %v1136_v26 = vadd.f32 %v1134_v2, %v1129_v49 }
 0x79f   :  { %v1137_v21 = vmul.f32 0.70710677, %v1136_v26  ;;  %v1163_v11 = vmul.f32 0.5, %v1136_v26 }
 0x7a1   :  { %v1138_v50 = vand.u32 2147483647, %v1137_v21  ;;  %vm1160_vm3 = vcmp.ge.f32.partialorder %v1137_v21, 0.0 }
 0x7a3   :  { %v1139_v51 = vmul.f32 0.3275911, %v1138_v50  ;;  %v1154_v55 = vsub.f32 0.0, %v1138_v50 }
 0x7a5   :  { %v1140_v52 = vadd.f32 1.0, %v1139_v51  ;;  %v1155_v58 = vmul.f32 %v1154_v55, %v1138_v50 }
 0x7a7   :  { %1658 = vrcp.f32 %v1140_v52  ;;  %v1156_v16 = vmul.f32 1.442695, %v1155_v58 }
 0x7a9   :  { %1660 = vpow2.f32 %v1156_v16 }
 0x7b1   :  { %v1659_v53 = vpop.eup %1658 }
 0x7b2   :  { %v1142_v54 = vmul.f32 %v1659_v53, %v1140_v52 }
 0x7b3   :  { %v1661_v27 = vpop.eup %1660 }
 0x7b4   :  { %v1143_v56 = vsub.f32 2.0, %v1142_v54 }
 0x7b6   :  { %v1144_v57 = vmul.f32 %v1659_v53, %v1143_v56 }
 0x7b8   :  { %v1145_v59 = vmul.f32 1.0614054, %v1144_v57 }
 0x7ba   :  { %v1146_v61 = vadd.f32 -1.4531521, %v1145_v59 }
 0x7bc   :  { %v1147_v62 = vmul.f32 %v1146_v61, %v1144_v57 }
 0x7be   :  { %v1148_v0 = vadd.f32 1.4214138, %v1147_v62 }
 0x7c0   :  { %v1149_v1 = vmul.f32 %v1148_v0, %v1144_v57 }
 0x7c2   :  { %v1150_v6 = vadd.f32 -0.28449672, %v1149_v1 }
 0x7c4   :  { %v1151_v7 = vmul.f32 %v1150_v6, %v1144_v57 }
 0x7c6   :  { %v1152_v10 = vadd.f32 0.2548296, %v1151_v7 }
 0x7c8   :  { %v1153_v12 = vmul.f32 %v1152_v10, %v1144_v57 }
 0x7ca   :  { %v1158_v15 = vmul.f32 %v1661_v27, %v1153_v12 }
 0x7cc   :  { %v1159_v63 = vsub.f32 1.0, %v1158_v15 }
 0x7ce   :  { %v1161_v5 = vsub.f32 0.0, %v1159_v63 }
 0x7d0   :  { %v1162_v8 = vsel %vm1160_vm3, %v1159_v63, %v1161_v5 }
 0x7d1   :  { %v1164_v20 = vadd.f32 1.0, %v1162_v8 }
 0x7d3   :  { %v1165_v19 = vmul.f32 %v1164_v20, %v1163_v11 }
 0x7d5   :  { %1166 = vst [vmem:[%s2109_s12] sm:$0xff] %v1165_v19 }

</bundles_post_ra>
